<compile_context>
chip_gen: v7x
topology: tpu7x:2x2x1
jax: 0.10.0
libtpu: 0.0.40
codegen_flags: <defaults>
</compile_context>

<pallas_src>
import functools
import math

import jax
import jax.numpy as jnp
from jax.experimental import pallas as pl
from jax.experimental.pallas import tpu as pltpu


# tiny BERT config (stand-in for bert-base-portuguese-cased at toy size)
CFG = dict(vocab=128, hidden=32, heads=2, layers=2, intermediate=64,
           max_pos=16, type_vocab=2)

_VEC_W = 128   # lane width of the per-layer bias/LN slab


# ------------------------------ fused kernel --------------------------------

def _bert_fused_kernel(x_ref, mask_ref, embln_ref,
                       wqkv_ref, wo_ref, w1_ref, w2_ref, vec_ref,
                       poolw_ref, tail_ref, o_ref, *, n_heads):
    """Whole batch, whole network, one invocation; everything stays in VMEM."""
    f32 = jnp.float32

    B, S = mask_ref.shape
    H = x_ref.shape[-1]
    dH = H // n_heads
    I = w1_ref.shape[-1]
    L = wqkv_ref.shape[0]

    def layer_norm(x, g, b):
        mean = jnp.mean(x, axis=-1, keepdims=True)
        var = jnp.mean((x - mean) ** 2, axis=-1, keepdims=True)
        return (x - mean) * jax.lax.rsqrt(var + 1e-12) * g + b

    def gelu(y):  # exact erf GELU (HF BERT default)
        return 0.5 * y * (1.0 + jax.lax.erf(y * 0.7071067811865476))

    x = x_ref[...].astype(f32)                       # (B*S, H)
    mask = mask_ref[...].astype(f32)                 # (B, S) additive key bias

    # embedding LayerNorm
    x = layer_norm(x, embln_ref[0:1, :], embln_ref[1:2, :])

    for l in range(L):                               # static unroll (L=2)
        vec = vec_ref[l]                             # (8, 128) per-layer vectors
        bqkv = vec[0:1, 0:3 * H]                     # q part pre-scaled at pack time
        bo   = vec[1:2, 0:H]
        ln1g = vec[2:3, 0:H]
        ln1b = vec[3:4, 0:H]
        b1   = vec[4:5, 0:I]
        b2   = vec[5:6, 0:H]
        ln2g = vec[6:7, 0:H]
        ln2b = vec[7:8, 0:H]

        # ---- fused QKV projection over ALL rows of the batch: (B*S,H)@(H,3H)
        qkv = jnp.dot(x, wqkv_ref[l], preferred_element_type=f32) + bqkv

        wo_l = wo_ref[l]                             # (H, H)

        # ---- attention per (b, head); per-head accumulation into out-proj
        attn_rows = []
        for b in range(B):                           # static unroll (B=2)
            r0 = b * S                               # sublane-aligned row offset
            attn_b = jnp.zeros((S, H), f32)
            for h in range(n_heads):                 # static unroll (nH=2)
                lo, hi = h * dH, (h + 1) * dH
                qh = qkv[r0:r0 + S, lo:hi]           # (S, dH), already scaled
                kh = qkv[r0:r0 + S, H + lo:H + hi]
                vh = qkv[r0:r0 + S, 2 * H + lo:2 * H + hi]
                s = jax.lax.dot_general(qh, kh, (((1,), (1,)), ((), ())),
                                        preferred_element_type=f32)   # (S, S)
                s = s + mask[b:b + 1, :]             # broadcast over queries
                s = s - jnp.max(s, axis=-1, keepdims=True)
                p = jnp.exp(s)
                p = p * pl.reciprocal(jnp.sum(p, axis=-1, keepdims=True),
                                      approx=True)
                ctx = jnp.dot(p, vh, preferred_element_type=f32)      # (S, dH)
                # accumulate straight into the out-projection (no head concat)
                attn_b = attn_b + jnp.dot(ctx, wo_l[lo:hi, :],
                                          preferred_element_type=f32)
            attn_rows.append(attn_b)
        attn = jnp.concatenate(attn_rows, axis=0)    # (B*S, H), sublane-aligned

        x = layer_norm(x + attn + bo, ln1g, ln1b)

        # ---- feed-forward over all rows ----
        hid = gelu(jnp.dot(x, w1_ref[l], preferred_element_type=f32) + b1)
        ff = jnp.dot(hid, w2_ref[l], preferred_element_type=f32) + b2
        x = layer_norm(x + ff, ln2g, ln2b)

    # ---- pooler ([CLS] rows) + regressor, fused ----
    cls = jnp.concatenate([x[b * S:b * S + 1, :] for b in range(B)], axis=0)  # (B, H)
    pooled = jnp.tanh(jnp.dot(cls, poolw_ref[...], preferred_element_type=f32)
                      + tail_ref[0:1, :])            # (B, H)
    reg_w = tail_ref[1:2, :]                         # (1, H)
    reg_b = tail_ref[2:3, 0:1]                       # (1, 1)
    out = jnp.sum(pooled * reg_w, axis=-1, keepdims=True) + reg_b        # (B, 1)
    o_ref[...] = out.astype(o_ref.dtype)             # single store


# ------------------------------ params --------------------------------------

def init_params(key, cfg):
    H, I, L = cfg["hidden"], cfg["intermediate"], cfg["layers"]
    keys = iter(jax.random.split(key, 8 + 12 * L))

    def nrm(shape):
        return (0.02 * jax.random.normal(next(keys), shape)).astype(jnp.float32)

    def zeros(shape):
        return jnp.zeros(shape, jnp.float32)

    def ones(shape):
        return jnp.ones(shape, jnp.float32)

    params = dict(
        word_emb=nrm((cfg["vocab"], H)),
        pos_emb=nrm((cfg["max_pos"], H)),
        type_emb=nrm((cfg["type_vocab"], H)),
        emb_ln_g=ones((H,)), emb_ln_b=zeros((H,)),
        layers=[],
        pool_w=nrm((H, H)), pool_b=zeros((H,)),
        reg_w=nrm((H, 1)), reg_b=zeros((1,)),
    )
    for _ in range(L):
        params["layers"].append(dict(
            wq=nrm((H, H)), bq=zeros((H,)),
            wk=nrm((H, H)), bk=zeros((H,)),
            wv=nrm((H, H)), bv=zeros((H,)),
            wo=nrm((H, H)), bo=zeros((H,)),
            ln1_g=ones((H,)), ln1_b=zeros((H,)),
            w1=nrm((H, I)), b1=zeros((I,)),
            w2=nrm((I, H)), b2=zeros((H,)),
            ln2_g=ones((H,)), ln2_b=zeros((H,)),
        ))
    return params


def pack_params(params, cfg):
    """One-time packing (call OUTSIDE jit).

    * QKV weights/biases concatenated, 1/sqrt(dH) folded into the q columns.
    * All per-layer vectors (biases + LN params) stacked into one (L, 8, 128)
      slab so the kernel sees a single DMA stream for them.
    """
    H, I, L = cfg["hidden"], cfg["intermediate"], cfg["layers"]
    nH = cfg["heads"]
    scale = 1.0 / math.sqrt(H // nH)
    layers = params["layers"]

    wqkv = jnp.stack([jnp.concatenate([l["wq"] * scale, l["wk"], l["wv"]], axis=1)
                      for l in layers])                                   # (L, H, 3H)
    wo = jnp.stack([l["wo"] for l in layers])                             # (L, H, H)
    w1 = jnp.stack([l["w1"] for l in layers])                             # (L, H, I)
    w2 = jnp.stack([l["w2"] for l in layers])                             # (L, I, H)

    def row(v):
        return jnp.pad(v, (0, _VEC_W - v.shape[0]))

    vec = jnp.stack([jnp.stack([
        row(jnp.concatenate([l["bq"] * scale, l["bk"], l["bv"]])),        # 3H
        row(l["bo"]),
        row(l["ln1_g"]), row(l["ln1_b"]),
        row(l["b1"]),
        row(l["b2"]),
        row(l["ln2_g"]), row(l["ln2_b"]),
    ]) for l in layers])                                                  # (L, 8, 128)

    embln = jnp.stack([params["emb_ln_g"], params["emb_ln_b"]])           # (2, H)
    tail = jnp.stack([params["pool_b"],
                      params["reg_w"][:, 0],
                      jnp.pad(params["reg_b"], (0, H - 1))])              # (3, H)

    return dict(word_emb=params["word_emb"], pos_emb=params["pos_emb"],
                type_emb=params["type_emb"],
                embln=embln, wqkv=wqkv, wo=wo, w1=w1, w2=w2, vec=vec,
                pool_w=params["pool_w"], tail=tail)


# ------------------------------ forward --------------------------------------

def bert_vowel_density_forward(packed, input_ids, attention_mask=None,
                               token_type_ids=None):
    cfg = CFG
    B, S = input_ids.shape
    H, I, L, nH = cfg["hidden"], cfg["intermediate"], cfg["layers"], cfg["heads"]
    dH = H // nH

    if attention_mask is None:
        attention_mask = jnp.ones((B, S), jnp.int32)
    if token_type_ids is None:
        token_type_ids = jnp.zeros((B, S), jnp.int32)

    # embedding gathers (JAX glue), flattened to a 2-D activation slab
    emb = (packed["word_emb"][input_ids]
           + packed["pos_emb"][:S][None, :, :]
           + packed["type_emb"][token_type_ids]).astype(jnp.float32)      # (B, S, H)
    x2 = emb.reshape(B * S, H)

    # HF-style additive mask bias over keys
    mask_bias = (1.0 - attention_mask.astype(jnp.float32)) * -10000.0     # (B, S)

    args = (x2, mask_bias, packed["embln"], packed["wqkv"], packed["wo"],
            packed["w1"], packed["w2"], packed["vec"], packed["pool_w"],
            packed["tail"])

    # advisory cost estimate
    flops = B * (L * (2 * S * H * 3 * H           # fused QKV
                      + nH * 4 * S * S * dH       # scores + context
                      + 2 * S * H * H             # per-head out-proj (total)
                      + 4 * S * H * I)            # FFN
                 + 2 * H * H + 2 * H)             # pooler + regressor
    trans = B * (L * (nH * S * S + S * I) + H)    # exp + erf + tanh
    bytes_accessed = (sum(int(math.prod(a.shape)) * a.dtype.itemsize for a in args)
                      + B * 4)

    kernel = functools.partial(_bert_fused_kernel, n_heads=nH)
    out = pl.pallas_call(
        kernel,
        out_shape=jax.ShapeDtypeStruct((B, 1), jnp.float32),
        cost_estimate=pl.CostEstimate(flops=flops, transcendentals=trans,
                                      bytes_accessed=bytes_accessed),
    )(*args)

    return out.reshape(B)      # mirrors .squeeze() for B > 1


# ---------------------------------- main -------------------------------------

if __name__ == "__main__":
    key = jax.random.PRNGKey(0)
    k_params, k_ids = jax.random.split(key)

    B, S = 2, 8
    params = init_params(k_params, CFG)
    packed = pack_params(params, CFG)          # one-time packing, OUTSIDE jit

    input_ids = jax.random.randint(k_ids, (B, S), 0, CFG["vocab"], dtype=jnp.int32)
    attention_mask = jnp.ones((B, S), jnp.int32).at[1, 6:].set(0)   # pad 2 tokens of row 1
    token_type_ids = jnp.zeros((B, S), jnp.int32)

    fwd = jax.jit(bert_vowel_density_forward)
    out = fwd(packed, input_ids, attention_mask, token_type_ids)
    out = jax.block_until_ready(out)

    assert out.shape == (B,), out.shape
    assert bool(jnp.all(jnp.isfinite(out)))
    print("KERNEL_OK")
</pallas_src>

<mosaic_0001>
module attributes {stable_mosaic.version = 11 : i64} {
  func.func @_bert_fused_kernel(%arg0: memref<16x32xf32, #tpu.memory_space<vmem>>, %arg1: memref<2x8xf32, #tpu.memory_space<vmem>>, %arg2: memref<2x32xf32, #tpu.memory_space<vmem>>, %arg3: memref<2x32x96xf32, #tpu.memory_space<vmem>>, %arg4: memref<2x32x32xf32, #tpu.memory_space<vmem>>, %arg5: memref<2x32x64xf32, #tpu.memory_space<vmem>>, %arg6: memref<2x64x32xf32, #tpu.memory_space<vmem>>, %arg7: memref<2x8x128xf32, #tpu.memory_space<vmem>>, %arg8: memref<32x32xf32, #tpu.memory_space<vmem>>, %arg9: memref<3x32xf32, #tpu.memory_space<vmem>>, %arg10: memref<2x1xf32, #tpu.memory_space<vmem>>) attributes {dimension_semantics = [], scalar_prefetch = 0 : i64, scratch_operands = 0 : i64, tpu.core_type = #tpu.core_type<tc>} {
    %c0 = arith.constant 0 : index
    %c0_0 = arith.constant 0 : index
    %0 = vector.load %arg0[%c0, %c0_0] : memref<16x32xf32, #tpu.memory_space<vmem>>, vector<16x32xf32>
    %c0_1 = arith.constant 0 : index
    %c0_2 = arith.constant 0 : index
    %1 = vector.load %arg1[%c0_1, %c0_2] : memref<2x8xf32, #tpu.memory_space<vmem>>, vector<2x8xf32>
    %c0_3 = arith.constant 0 : index
    %c0_4 = arith.constant 0 : index
    %2 = vector.load %arg2[%c0_3, %c0_4] : memref<2x32xf32, #tpu.memory_space<vmem>>, vector<1x32xf32>
    %c1 = arith.constant 1 : index
    %c0_5 = arith.constant 0 : index
    %3 = vector.load %arg2[%c1, %c0_5] : memref<2x32xf32, #tpu.memory_space<vmem>>, vector<1x32xf32>
    %cst = arith.constant dense<0.000000e+00> : vector<16xf32>
    %4 = vector.multi_reduction <add>, %0, %cst [1] : vector<16x32xf32> to vector<16xf32>
    %5 = vector.shape_cast %4 : vector<16xf32> to vector<16x1xf32>
    %cst_6 = arith.constant 3.200000e+01 : f32
    %6 = vector.broadcast %cst_6 : f32 to vector<16x1xf32>
    %7 = arith.divf %5, %6 : vector<16x1xf32>
    %8 = vector.broadcast %7 : vector<16x1xf32> to vector<16x32xf32>
    %9 = arith.subf %0, %8 : vector<16x32xf32>
    %10 = arith.mulf %9, %9 : vector<16x32xf32>
    %cst_7 = arith.constant dense<0.000000e+00> : vector<16xf32>
    %11 = vector.multi_reduction <add>, %10, %cst_7 [1] : vector<16x32xf32> to vector<16xf32>
    %12 = vector.shape_cast %11 : vector<16xf32> to vector<16x1xf32>
    %cst_8 = arith.constant 3.200000e+01 : f32
    %13 = vector.broadcast %cst_8 : f32 to vector<16x1xf32>
    %14 = arith.divf %12, %13 : vector<16x1xf32>
    %15 = vector.broadcast %7 : vector<16x1xf32> to vector<16x32xf32>
    %16 = arith.subf %0, %15 : vector<16x32xf32>
    %cst_9 = arith.constant 9.99999996E-13 : f32
    %17 = vector.broadcast %cst_9 : f32 to vector<16x1xf32>
    %18 = arith.addf %14, %17 : vector<16x1xf32>
    %19 = math.rsqrt %18 : vector<16x1xf32>
    %20 = vector.broadcast %19 : vector<16x1xf32> to vector<16x32xf32>
    %21 = arith.mulf %16, %20 : vector<16x32xf32>
    %22 = vector.broadcast %2 : vector<1x32xf32> to vector<16x32xf32>
    %23 = arith.mulf %21, %22 : vector<16x32xf32>
    %24 = vector.broadcast %3 : vector<1x32xf32> to vector<16x32xf32>
    %25 = arith.addf %23, %24 : vector<16x32xf32>
    %c0_10 = arith.constant 0 : index
    %c0_11 = arith.constant 0 : index
    %c0_12 = arith.constant 0 : index
    %26 = vector.load %arg7[%c0_10, %c0_11, %c0_12] : memref<2x8x128xf32, #tpu.memory_space<vmem>>, vector<1x8x128xf32>
    %27 = vector.shape_cast %26 : vector<1x8x128xf32> to vector<8x128xf32>
    %28 = vector.extract_strided_slice %27 {offsets = [0, 0], sizes = [1, 96], strides = [1, 1]} : vector<8x128xf32> to vector<1x96xf32>
    %29 = vector.extract_strided_slice %27 {offsets = [1, 0], sizes = [1, 32], strides = [1, 1]} : vector<8x128xf32> to vector<1x32xf32>
    %30 = vector.extract_strided_slice %27 {offsets = [2, 0], sizes = [1, 32], strides = [1, 1]} : vector<8x128xf32> to vector<1x32xf32>
    %31 = vector.extract_strided_slice %27 {offsets = [3, 0], sizes = [1, 32], strides = [1, 1]} : vector<8x128xf32> to vector<1x32xf32>
    %32 = vector.extract_strided_slice %27 {offsets = [4, 0], sizes = [1, 64], strides = [1, 1]} : vector<8x128xf32> to vector<1x64xf32>
    %33 = vector.extract_strided_slice %27 {offsets = [5, 0], sizes = [1, 32], strides = [1, 1]} : vector<8x128xf32> to vector<1x32xf32>
    %34 = vector.extract_strided_slice %27 {offsets = [6, 0], sizes = [1, 32], strides = [1, 1]} : vector<8x128xf32> to vector<1x32xf32>
    %35 = vector.extract_strided_slice %27 {offsets = [7, 0], sizes = [1, 32], strides = [1, 1]} : vector<8x128xf32> to vector<1x32xf32>
    %c0_13 = arith.constant 0 : index
    %c0_14 = arith.constant 0 : index
    %c0_15 = arith.constant 0 : index
    %36 = vector.load %arg3[%c0_13, %c0_14, %c0_15] : memref<2x32x96xf32, #tpu.memory_space<vmem>>, vector<1x32x96xf32>
    %37 = vector.shape_cast %36 : vector<1x32x96xf32> to vector<32x96xf32>
    %cst_16 = arith.constant dense<0.000000e+00> : vector<16x96xf32>
    %38 = tpu.matmul %25, %37, %cst_16 {dimension_numbers = #tpu.dot_dimension_numbers<[1], [0], [0], [1], [0, 0, 1, 1], [], []>} : vector<16x32xf32>, vector<32x96xf32>, vector<16x96xf32> -> vector<16x96xf32>
    %39 = vector.broadcast %28 : vector<1x96xf32> to vector<16x96xf32>
    %40 = arith.addf %38, %39 : vector<16x96xf32>
    %c0_17 = arith.constant 0 : index
    %c0_18 = arith.constant 0 : index
    %c0_19 = arith.constant 0 : index
    %41 = vector.load %arg4[%c0_17, %c0_18, %c0_19] : memref<2x32x32xf32, #tpu.memory_space<vmem>>, vector<1x32x32xf32>
    %42 = vector.shape_cast %41 : vector<1x32x32xf32> to vector<32x32xf32>
    %cst_20 = arith.constant 0.000000e+00 : f32
    %43 = vector.broadcast %cst_20 : f32 to vector<8x32xf32>
    %44 = vector.extract_strided_slice %40 {offsets = [0, 0], sizes = [8, 16], strides = [1, 1]} : vector<16x96xf32> to vector<8x16xf32>
    %45 = vector.extract_strided_slice %40 {offsets = [0, 32], sizes = [8, 16], strides = [1, 1]} : vector<16x96xf32> to vector<8x16xf32>
    %46 = vector.extract_strided_slice %40 {offsets = [0, 64], sizes = [8, 16], strides = [1, 1]} : vector<16x96xf32> to vector<8x16xf32>
    %cst_21 = arith.constant dense<0.000000e+00> : vector<8x8xf32>
    %47 = tpu.matmul %44, %45, %cst_21 {dimension_numbers = #tpu.dot_dimension_numbers<[1], [1], [0], [0], [0, 0, 1, 0], [], []>} : vector<8x16xf32>, vector<8x16xf32>, vector<8x8xf32> -> vector<8x8xf32>
    %48 = vector.extract_strided_slice %1 {offsets = [0, 0], sizes = [1, 8], strides = [1, 1]} : vector<2x8xf32> to vector<1x8xf32>
    %49 = vector.broadcast %48 : vector<1x8xf32> to vector<8x8xf32>
    %50 = arith.addf %47, %49 : vector<8x8xf32>
    %cst_22 = arith.constant dense<0xFF800000> : vector<8xf32>
    %51 = vector.multi_reduction <maximumf>, %50, %cst_22 [1] : vector<8x8xf32> to vector<8xf32>
    %52 = vector.shape_cast %51 : vector<8xf32> to vector<8x1xf32>
    %53 = vector.broadcast %52 : vector<8x1xf32> to vector<8x8xf32>
    %54 = arith.subf %50, %53 : vector<8x8xf32>
    %55 = math.exp %54 : vector<8x8xf32>
    %cst_23 = arith.constant dense<0.000000e+00> : vector<8xf32>
    %56 = vector.multi_reduction <add>, %55, %cst_23 [1] : vector<8x8xf32> to vector<8xf32>
    %57 = vector.shape_cast %56 : vector<8xf32> to vector<8x1xf32>
    %58 = tpu.reciprocal %57 {approx = true} : vector<8x1xf32> -> vector<8x1xf32>
    %59 = vector.broadcast %58 : vector<8x1xf32> to vector<8x8xf32>
    %60 = arith.mulf %55, %59 : vector<8x8xf32>
    %cst_24 = arith.constant dense<0.000000e+00> : vector<8x16xf32>
    %61 = tpu.matmul %60, %46, %cst_24 {dimension_numbers = #tpu.dot_dimension_numbers<[1], [0], [0], [1], [0, 0, 1, 1], [], []>} : vector<8x8xf32>, vector<8x16xf32>, vector<8x16xf32> -> vector<8x16xf32>
    %62 = vector.extract_strided_slice %42 {offsets = [0, 0], sizes = [16, 32], strides = [1, 1]} : vector<32x32xf32> to vector<16x32xf32>
    %cst_25 = arith.constant dense<0.000000e+00> : vector<8x32xf32>
    %63 = tpu.matmul %61, %62, %cst_25 {dimension_numbers = #tpu.dot_dimension_numbers<[1], [0], [0], [1], [0, 0, 1, 1], [], []>} : vector<8x16xf32>, vector<16x32xf32>, vector<8x32xf32> -> vector<8x32xf32>
    %64 = arith.addf %43, %63 : vector<8x32xf32>
    %65 = vector.extract_strided_slice %40 {offsets = [0, 16], sizes = [8, 16], strides = [1, 1]} : vector<16x96xf32> to vector<8x16xf32>
    %66 = vector.extract_strided_slice %40 {offsets = [0, 48], sizes = [8, 16], strides = [1, 1]} : vector<16x96xf32> to vector<8x16xf32>
    %67 = vector.extract_strided_slice %40 {offsets = [0, 80], sizes = [8, 16], strides = [1, 1]} : vector<16x96xf32> to vector<8x16xf32>
    %cst_26 = arith.constant dense<0.000000e+00> : vector<8x8xf32>
    %68 = tpu.matmul %65, %66, %cst_26 {dimension_numbers = #tpu.dot_dimension_numbers<[1], [1], [0], [0], [0, 0, 1, 0], [], []>} : vector<8x16xf32>, vector<8x16xf32>, vector<8x8xf32> -> vector<8x8xf32>
    %69 = vector.extract_strided_slice %1 {offsets = [0, 0], sizes = [1, 8], strides = [1, 1]} : vector<2x8xf32> to vector<1x8xf32>
    %70 = vector.broadcast %69 : vector<1x8xf32> to vector<8x8xf32>
    %71 = arith.addf %68, %70 : vector<8x8xf32>
    %cst_27 = arith.constant dense<0xFF800000> : vector<8xf32>
    %72 = vector.multi_reduction <maximumf>, %71, %cst_27 [1] : vector<8x8xf32> to vector<8xf32>
    %73 = vector.shape_cast %72 : vector<8xf32> to vector<8x1xf32>
    %74 = vector.broadcast %73 : vector<8x1xf32> to vector<8x8xf32>
    %75 = arith.subf %71, %74 : vector<8x8xf32>
    %76 = math.exp %75 : vector<8x8xf32>
    %cst_28 = arith.constant dense<0.000000e+00> : vector<8xf32>
    %77 = vector.multi_reduction <add>, %76, %cst_28 [1] : vector<8x8xf32> to vector<8xf32>
    %78 = vector.shape_cast %77 : vector<8xf32> to vector<8x1xf32>
    %79 = tpu.reciprocal %78 {approx = true} : vector<8x1xf32> -> vector<8x1xf32>
    %80 = vector.broadcast %79 : vector<8x1xf32> to vector<8x8xf32>
    %81 = arith.mulf %76, %80 : vector<8x8xf32>
    %cst_29 = arith.constant dense<0.000000e+00> : vector<8x16xf32>
    %82 = tpu.matmul %81, %67, %cst_29 {dimension_numbers = #tpu.dot_dimension_numbers<[1], [0], [0], [1], [0, 0, 1, 1], [], []>} : vector<8x8xf32>, vector<8x16xf32>, vector<8x16xf32> -> vector<8x16xf32>
    %83 = vector.extract_strided_slice %42 {offsets = [16, 0], sizes = [16, 32], strides = [1, 1]} : vector<32x32xf32> to vector<16x32xf32>
    %cst_30 = arith.constant dense<0.000000e+00> : vector<8x32xf32>
    %84 = tpu.matmul %82, %83, %cst_30 {dimension_numbers = #tpu.dot_dimension_numbers<[1], [0], [0], [1], [0, 0, 1, 1], [], []>} : vector<8x16xf32>, vector<16x32xf32>, vector<8x32xf32> -> vector<8x32xf32>
    %85 = arith.addf %64, %84 : vector<8x32xf32>
    %cst_31 = arith.constant 0.000000e+00 : f32
    %86 = vector.broadcast %cst_31 : f32 to vector<8x32xf32>
    %87 = vector.extract_strided_slice %40 {offsets = [8, 0], sizes = [8, 16], strides = [1, 1]} : vector<16x96xf32> to vector<8x16xf32>
    %88 = vector.extract_strided_slice %40 {offsets = [8, 32], sizes = [8, 16], strides = [1, 1]} : vector<16x96xf32> to vector<8x16xf32>
    %89 = vector.extract_strided_slice %40 {offsets = [8, 64], sizes = [8, 16], strides = [1, 1]} : vector<16x96xf32> to vector<8x16xf32>
    %cst_32 = arith.constant dense<0.000000e+00> : vector<8x8xf32>
    %90 = tpu.matmul %87, %88, %cst_32 {dimension_numbers = #tpu.dot_dimension_numbers<[1], [1], [0], [0], [0, 0, 1, 0], [], []>} : vector<8x16xf32>, vector<8x16xf32>, vector<8x8xf32> -> vector<8x8xf32>
    %91 = vector.extract_strided_slice %1 {offsets = [1, 0], sizes = [1, 8], strides = [1, 1]} : vector<2x8xf32> to vector<1x8xf32>
    %92 = vector.broadcast %91 : vector<1x8xf32> to vector<8x8xf32>
    %93 = arith.addf %90, %92 : vector<8x8xf32>
    %cst_33 = arith.constant dense<0xFF800000> : vector<8xf32>
    %94 = vector.multi_reduction <maximumf>, %93, %cst_33 [1] : vector<8x8xf32> to vector<8xf32>
    %95 = vector.shape_cast %94 : vector<8xf32> to vector<8x1xf32>
    %96 = vector.broadcast %95 : vector<8x1xf32> to vector<8x8xf32>
    %97 = arith.subf %93, %96 : vector<8x8xf32>
    %98 = math.exp %97 : vector<8x8xf32>
    %cst_34 = arith.constant dense<0.000000e+00> : vector<8xf32>
    %99 = vector.multi_reduction <add>, %98, %cst_34 [1] : vector<8x8xf32> to vector<8xf32>
    %100 = vector.shape_cast %99 : vector<8xf32> to vector<8x1xf32>
    %101 = tpu.reciprocal %100 {approx = true} : vector<8x1xf32> -> vector<8x1xf32>
    %102 = vector.broadcast %101 : vector<8x1xf32> to vector<8x8xf32>
    %103 = arith.mulf %98, %102 : vector<8x8xf32>
    %cst_35 = arith.constant dense<0.000000e+00> : vector<8x16xf32>
    %104 = tpu.matmul %103, %89, %cst_35 {dimension_numbers = #tpu.dot_dimension_numbers<[1], [0], [0], [1], [0, 0, 1, 1], [], []>} : vector<8x8xf32>, vector<8x16xf32>, vector<8x16xf32> -> vector<8x16xf32>
    %105 = vector.extract_strided_slice %42 {offsets = [0, 0], sizes = [16, 32], strides = [1, 1]} : vector<32x32xf32> to vector<16x32xf32>
    %cst_36 = arith.constant dense<0.000000e+00> : vector<8x32xf32>
    %106 = tpu.matmul %104, %105, %cst_36 {dimension_numbers = #tpu.dot_dimension_numbers<[1], [0], [0], [1], [0, 0, 1, 1], [], []>} : vector<8x16xf32>, vector<16x32xf32>, vector<8x32xf32> -> vector<8x32xf32>
    %107 = arith.addf %86, %106 : vector<8x32xf32>
    %108 = vector.extract_strided_slice %40 {offsets = [8, 16], sizes = [8, 16], strides = [1, 1]} : vector<16x96xf32> to vector<8x16xf32>
    %109 = vector.extract_strided_slice %40 {offsets = [8, 48], sizes = [8, 16], strides = [1, 1]} : vector<16x96xf32> to vector<8x16xf32>
    %110 = vector.extract_strided_slice %40 {offsets = [8, 80], sizes = [8, 16], strides = [1, 1]} : vector<16x96xf32> to vector<8x16xf32>
    %cst_37 = arith.constant dense<0.000000e+00> : vector<8x8xf32>
    %111 = tpu.matmul %108, %109, %cst_37 {dimension_numbers = #tpu.dot_dimension_numbers<[1], [1], [0], [0], [0, 0, 1, 0], [], []>} : vector<8x16xf32>, vector<8x16xf32>, vector<8x8xf32> -> vector<8x8xf32>
    %112 = vector.extract_strided_slice %1 {offsets = [1, 0], sizes = [1, 8], strides = [1, 1]} : vector<2x8xf32> to vector<1x8xf32>
    %113 = vector.broadcast %112 : vector<1x8xf32> to vector<8x8xf32>
    %114 = arith.addf %111, %113 : vector<8x8xf32>
    %cst_38 = arith.constant dense<0xFF800000> : vector<8xf32>
    %115 = vector.multi_reduction <maximumf>, %114, %cst_38 [1] : vector<8x8xf32> to vector<8xf32>
    %116 = vector.shape_cast %115 : vector<8xf32> to vector<8x1xf32>
    %117 = vector.broadcast %116 : vector<8x1xf32> to vector<8x8xf32>
    %118 = arith.subf %114, %117 : vector<8x8xf32>
    %119 = math.exp %118 : vector<8x8xf32>
    %cst_39 = arith.constant dense<0.000000e+00> : vector<8xf32>
    %120 = vector.multi_reduction <add>, %119, %cst_39 [1] : vector<8x8xf32> to vector<8xf32>
    %121 = vector.shape_cast %120 : vector<8xf32> to vector<8x1xf32>
    %122 = tpu.reciprocal %121 {approx = true} : vector<8x1xf32> -> vector<8x1xf32>
    %123 = vector.broadcast %122 : vector<8x1xf32> to vector<8x8xf32>
    %124 = arith.mulf %119, %123 : vector<8x8xf32>
    %cst_40 = arith.constant dense<0.000000e+00> : vector<8x16xf32>
    %125 = tpu.matmul %124, %110, %cst_40 {dimension_numbers = #tpu.dot_dimension_numbers<[1], [0], [0], [1], [0, 0, 1, 1], [], []>} : vector<8x8xf32>, vector<8x16xf32>, vector<8x16xf32> -> vector<8x16xf32>
    %126 = vector.extract_strided_slice %42 {offsets = [16, 0], sizes = [16, 32], strides = [1, 1]} : vector<32x32xf32> to vector<16x32xf32>
    %cst_41 = arith.constant dense<0.000000e+00> : vector<8x32xf32>
    %127 = tpu.matmul %125, %126, %cst_41 {dimension_numbers = #tpu.dot_dimension_numbers<[1], [0], [0], [1], [0, 0, 1, 1], [], []>} : vector<8x16xf32>, vector<16x32xf32>, vector<8x32xf32> -> vector<8x32xf32>
    %128 = arith.addf %107, %127 : vector<8x32xf32>
    %129 = tpu.concatenate %85, %128 in 0 : vector<8x32xf32>, vector<8x32xf32> -> vector<16x32xf32>
    %130 = arith.addf %25, %129 : vector<16x32xf32>
    %131 = vector.broadcast %29 : vector<1x32xf32> to vector<16x32xf32>
    %132 = arith.addf %130, %131 : vector<16x32xf32>
    %cst_42 = arith.constant dense<0.000000e+00> : vector<16xf32>
    %133 = vector.multi_reduction <add>, %132, %cst_42 [1] : vector<16x32xf32> to vector<16xf32>
    %134 = vector.shape_cast %133 : vector<16xf32> to vector<16x1xf32>
    %cst_43 = arith.constant 3.200000e+01 : f32
    %135 = vector.broadcast %cst_43 : f32 to vector<16x1xf32>
    %136 = arith.divf %134, %135 : vector<16x1xf32>
    %137 = vector.broadcast %136 : vector<16x1xf32> to vector<16x32xf32>
    %138 = arith.subf %132, %137 : vector<16x32xf32>
    %139 = arith.mulf %138, %138 : vector<16x32xf32>
    %cst_44 = arith.constant dense<0.000000e+00> : vector<16xf32>
    %140 = vector.multi_reduction <add>, %139, %cst_44 [1] : vector<16x32xf32> to vector<16xf32>
    %141 = vector.shape_cast %140 : vector<16xf32> to vector<16x1xf32>
    %cst_45 = arith.constant 3.200000e+01 : f32
    %142 = vector.broadcast %cst_45 : f32 to vector<16x1xf32>
    %143 = arith.divf %141, %142 : vector<16x1xf32>
    %144 = vector.broadcast %136 : vector<16x1xf32> to vector<16x32xf32>
    %145 = arith.subf %132, %144 : vector<16x32xf32>
    %cst_46 = arith.constant 9.99999996E-13 : f32
    %146 = vector.broadcast %cst_46 : f32 to vector<16x1xf32>
    %147 = arith.addf %143, %146 : vector<16x1xf32>
    %148 = math.rsqrt %147 : vector<16x1xf32>
    %149 = vector.broadcast %148 : vector<16x1xf32> to vector<16x32xf32>
    %150 = arith.mulf %145, %149 : vector<16x32xf32>
    %151 = vector.broadcast %30 : vector<1x32xf32> to vector<16x32xf32>
    %152 = arith.mulf %150, %151 : vector<16x32xf32>
    %153 = vector.broadcast %31 : vector<1x32xf32> to vector<16x32xf32>
    %154 = arith.addf %152, %153 : vector<16x32xf32>
    %c0_47 = arith.constant 0 : index
    %c0_48 = arith.constant 0 : index
    %c0_49 = arith.constant 0 : index
    %155 = vector.load %arg5[%c0_47, %c0_48, %c0_49] : memref<2x32x64xf32, #tpu.memory_space<vmem>>, vector<1x32x64xf32>
    %156 = vector.shape_cast %155 : vector<1x32x64xf32> to vector<32x64xf32>
    %cst_50 = arith.constant dense<0.000000e+00> : vector<16x64xf32>
    %157 = tpu.matmul %154, %156, %cst_50 {dimension_numbers = #tpu.dot_dimension_numbers<[1], [0], [0], [1], [0, 0, 1, 1], [], []>} : vector<16x32xf32>, vector<32x64xf32>, vector<16x64xf32> -> vector<16x64xf32>
    %158 = vector.broadcast %32 : vector<1x64xf32> to vector<16x64xf32>
    %159 = arith.addf %157, %158 : vector<16x64xf32>
    %cst_51 = arith.constant 5.000000e-01 : f32
    %160 = vector.broadcast %cst_51 : f32 to vector<16x64xf32>
    %161 = arith.mulf %160, %159 : vector<16x64xf32>
    %cst_52 = arith.constant 0.707106769 : f32
    %162 = vector.broadcast %cst_52 : f32 to vector<16x64xf32>
    %163 = arith.mulf %159, %162 : vector<16x64xf32>
    %164 = math.erf %163 : vector<16x64xf32>
    %cst_53 = arith.constant 1.000000e+00 : f32
    %165 = vector.broadcast %cst_53 : f32 to vector<16x64xf32>
    %166 = arith.addf %165, %164 : vector<16x64xf32>
    %167 = arith.mulf %161, %166 : vector<16x64xf32>
    %c0_54 = arith.constant 0 : index
    %c0_55 = arith.constant 0 : index
    %c0_56 = arith.constant 0 : index
    %168 = vector.load %arg6[%c0_54, %c0_55, %c0_56] : memref<2x64x32xf32, #tpu.memory_space<vmem>>, vector<1x64x32xf32>
    %169 = vector.shape_cast %168 : vector<1x64x32xf32> to vector<64x32xf32>
    %cst_57 = arith.constant dense<0.000000e+00> : vector<16x32xf32>
    %170 = tpu.matmul %167, %169, %cst_57 {dimension_numbers = #tpu.dot_dimension_numbers<[1], [0], [0], [1], [0, 0, 1, 1], [], []>} : vector<16x64xf32>, vector<64x32xf32>, vector<16x32xf32> -> vector<16x32xf32>
    %171 = vector.broadcast %33 : vector<1x32xf32> to vector<16x32xf32>
    %172 = arith.addf %170, %171 : vector<16x32xf32>
    %173 = arith.addf %154, %172 : vector<16x32xf32>
    %cst_58 = arith.constant dense<0.000000e+00> : vector<16xf32>
    %174 = vector.multi_reduction <add>, %173, %cst_58 [1] : vector<16x32xf32> to vector<16xf32>
    %175 = vector.shape_cast %174 : vector<16xf32> to vector<16x1xf32>
    %cst_59 = arith.constant 3.200000e+01 : f32
    %176 = vector.broadcast %cst_59 : f32 to vector<16x1xf32>
    %177 = arith.divf %175, %176 : vector<16x1xf32>
    %178 = vector.broadcast %177 : vector<16x1xf32> to vector<16x32xf32>
    %179 = arith.subf %173, %178 : vector<16x32xf32>
    %180 = arith.mulf %179, %179 : vector<16x32xf32>
    %cst_60 = arith.constant dense<0.000000e+00> : vector<16xf32>
    %181 = vector.multi_reduction <add>, %180, %cst_60 [1] : vector<16x32xf32> to vector<16xf32>
    %182 = vector.shape_cast %181 : vector<16xf32> to vector<16x1xf32>
    %cst_61 = arith.constant 3.200000e+01 : f32
    %183 = vector.broadcast %cst_61 : f32 to vector<16x1xf32>
    %184 = arith.divf %182, %183 : vector<16x1xf32>
    %185 = vector.broadcast %177 : vector<16x1xf32> to vector<16x32xf32>
    %186 = arith.subf %173, %185 : vector<16x32xf32>
    %cst_62 = arith.constant 9.99999996E-13 : f32
    %187 = vector.broadcast %cst_62 : f32 to vector<16x1xf32>
    %188 = arith.addf %184, %187 : vector<16x1xf32>
    %189 = math.rsqrt %188 : vector<16x1xf32>
    %190 = vector.broadcast %189 : vector<16x1xf32> to vector<16x32xf32>
    %191 = arith.mulf %186, %190 : vector<16x32xf32>
    %192 = vector.broadcast %34 : vector<1x32xf32> to vector<16x32xf32>
    %193 = arith.mulf %191, %192 : vector<16x32xf32>
    %194 = vector.broadcast %35 : vector<1x32xf32> to vector<16x32xf32>
    %195 = arith.addf %193, %194 : vector<16x32xf32>
    %c1_63 = arith.constant 1 : index
    %c0_64 = arith.constant 0 : index
    %c0_65 = arith.constant 0 : index
    %196 = vector.load %arg7[%c1_63, %c0_64, %c0_65] : memref<2x8x128xf32, #tpu.memory_space<vmem>>, vector<1x8x128xf32>
    %197 = vector.shape_cast %196 : vector<1x8x128xf32> to vector<8x128xf32>
    %198 = vector.extract_strided_slice %197 {offsets = [0, 0], sizes = [1, 96], strides = [1, 1]} : vector<8x128xf32> to vector<1x96xf32>
    %199 = vector.extract_strided_slice %197 {offsets = [1, 0], sizes = [1, 32], strides = [1, 1]} : vector<8x128xf32> to vector<1x32xf32>
    %200 = vector.extract_strided_slice %197 {offsets = [2, 0], sizes = [1, 32], strides = [1, 1]} : vector<8x128xf32> to vector<1x32xf32>
    %201 = vector.extract_strided_slice %197 {offsets = [3, 0], sizes = [1, 32], strides = [1, 1]} : vector<8x128xf32> to vector<1x32xf32>
    %202 = vector.extract_strided_slice %197 {offsets = [4, 0], sizes = [1, 64], strides = [1, 1]} : vector<8x128xf32> to vector<1x64xf32>
    %203 = vector.extract_strided_slice %197 {offsets = [5, 0], sizes = [1, 32], strides = [1, 1]} : vector<8x128xf32> to vector<1x32xf32>
    %204 = vector.extract_strided_slice %197 {offsets = [6, 0], sizes = [1, 32], strides = [1, 1]} : vector<8x128xf32> to vector<1x32xf32>
    %205 = vector.extract_strided_slice %197 {offsets = [7, 0], sizes = [1, 32], strides = [1, 1]} : vector<8x128xf32> to vector<1x32xf32>
    %c1_66 = arith.constant 1 : index
    %c0_67 = arith.constant 0 : index
    %c0_68 = arith.constant 0 : index
    %206 = vector.load %arg3[%c1_66, %c0_67, %c0_68] : memref<2x32x96xf32, #tpu.memory_space<vmem>>, vector<1x32x96xf32>
    %207 = vector.shape_cast %206 : vector<1x32x96xf32> to vector<32x96xf32>
    %cst_69 = arith.constant dense<0.000000e+00> : vector<16x96xf32>
    %208 = tpu.matmul %195, %207, %cst_69 {dimension_numbers = #tpu.dot_dimension_numbers<[1], [0], [0], [1], [0, 0, 1, 1], [], []>} : vector<16x32xf32>, vector<32x96xf32>, vector<16x96xf32> -> vector<16x96xf32>
    %209 = vector.broadcast %198 : vector<1x96xf32> to vector<16x96xf32>
    %210 = arith.addf %208, %209 : vector<16x96xf32>
    %c1_70 = arith.constant 1 : index
    %c0_71 = arith.constant 0 : index
    %c0_72 = arith.constant 0 : index
    %211 = vector.load %arg4[%c1_70, %c0_71, %c0_72] : memref<2x32x32xf32, #tpu.memory_space<vmem>>, vector<1x32x32xf32>
    %212 = vector.shape_cast %211 : vector<1x32x32xf32> to vector<32x32xf32>
    %cst_73 = arith.constant 0.000000e+00 : f32
    %213 = vector.broadcast %cst_73 : f32 to vector<8x32xf32>
    %214 = vector.extract_strided_slice %210 {offsets = [0, 0], sizes = [8, 16], strides = [1, 1]} : vector<16x96xf32> to vector<8x16xf32>
    %215 = vector.extract_strided_slice %210 {offsets = [0, 32], sizes = [8, 16], strides = [1, 1]} : vector<16x96xf32> to vector<8x16xf32>
    %216 = vector.extract_strided_slice %210 {offsets = [0, 64], sizes = [8, 16], strides = [1, 1]} : vector<16x96xf32> to vector<8x16xf32>
    %cst_74 = arith.constant dense<0.000000e+00> : vector<8x8xf32>
    %217 = tpu.matmul %214, %215, %cst_74 {dimension_numbers = #tpu.dot_dimension_numbers<[1], [1], [0], [0], [0, 0, 1, 0], [], []>} : vector<8x16xf32>, vector<8x16xf32>, vector<8x8xf32> -> vector<8x8xf32>
    %218 = vector.extract_strided_slice %1 {offsets = [0, 0], sizes = [1, 8], strides = [1, 1]} : vector<2x8xf32> to vector<1x8xf32>
    %219 = vector.broadcast %218 : vector<1x8xf32> to vector<8x8xf32>
    %220 = arith.addf %217, %219 : vector<8x8xf32>
    %cst_75 = arith.constant dense<0xFF800000> : vector<8xf32>
    %221 = vector.multi_reduction <maximumf>, %220, %cst_75 [1] : vector<8x8xf32> to vector<8xf32>
    %222 = vector.shape_cast %221 : vector<8xf32> to vector<8x1xf32>
    %223 = vector.broadcast %222 : vector<8x1xf32> to vector<8x8xf32>
    %224 = arith.subf %220, %223 : vector<8x8xf32>
    %225 = math.exp %224 : vector<8x8xf32>
    %cst_76 = arith.constant dense<0.000000e+00> : vector<8xf32>
    %226 = vector.multi_reduction <add>, %225, %cst_76 [1] : vector<8x8xf32> to vector<8xf32>
    %227 = vector.shape_cast %226 : vector<8xf32> to vector<8x1xf32>
    %228 = tpu.reciprocal %227 {approx = true} : vector<8x1xf32> -> vector<8x1xf32>
    %229 = vector.broadcast %228 : vector<8x1xf32> to vector<8x8xf32>
    %230 = arith.mulf %225, %229 : vector<8x8xf32>
    %cst_77 = arith.constant dense<0.000000e+00> : vector<8x16xf32>
    %231 = tpu.matmul %230, %216, %cst_77 {dimension_numbers = #tpu.dot_dimension_numbers<[1], [0], [0], [1], [0, 0, 1, 1], [], []>} : vector<8x8xf32>, vector<8x16xf32>, vector<8x16xf32> -> vector<8x16xf32>
    %232 = vector.extract_strided_slice %212 {offsets = [0, 0], sizes = [16, 32], strides = [1, 1]} : vector<32x32xf32> to vector<16x32xf32>
    %cst_78 = arith.constant dense<0.000000e+00> : vector<8x32xf32>
    %233 = tpu.matmul %231, %232, %cst_78 {dimension_numbers = #tpu.dot_dimension_numbers<[1], [0], [0], [1], [0, 0, 1, 1], [], []>} : vector<8x16xf32>, vector<16x32xf32>, vector<8x32xf32> -> vector<8x32xf32>
    %234 = arith.addf %213, %233 : vector<8x32xf32>
    %235 = vector.extract_strided_slice %210 {offsets = [0, 16], sizes = [8, 16], strides = [1, 1]} : vector<16x96xf32> to vector<8x16xf32>
    %236 = vector.extract_strided_slice %210 {offsets = [0, 48], sizes = [8, 16], strides = [1, 1]} : vector<16x96xf32> to vector<8x16xf32>
    %237 = vector.extract_strided_slice %210 {offsets = [0, 80], sizes = [8, 16], strides = [1, 1]} : vector<16x96xf32> to vector<8x16xf32>
    %cst_79 = arith.constant dense<0.000000e+00> : vector<8x8xf32>
    %238 = tpu.matmul %235, %236, %cst_79 {dimension_numbers = #tpu.dot_dimension_numbers<[1], [1], [0], [0], [0, 0, 1, 0], [], []>} : vector<8x16xf32>, vector<8x16xf32>, vector<8x8xf32> -> vector<8x8xf32>
    %239 = vector.extract_strided_slice %1 {offsets = [0, 0], sizes = [1, 8], strides = [1, 1]} : vector<2x8xf32> to vector<1x8xf32>
    %240 = vector.broadcast %239 : vector<1x8xf32> to vector<8x8xf32>
    %241 = arith.addf %238, %240 : vector<8x8xf32>
    %cst_80 = arith.constant dense<0xFF800000> : vector<8xf32>
    %242 = vector.multi_reduction <maximumf>, %241, %cst_80 [1] : vector<8x8xf32> to vector<8xf32>
    %243 = vector.shape_cast %242 : vector<8xf32> to vector<8x1xf32>
    %244 = vector.broadcast %243 : vector<8x1xf32> to vector<8x8xf32>
    %245 = arith.subf %241, %244 : vector<8x8xf32>
    %246 = math.exp %245 : vector<8x8xf32>
    %cst_81 = arith.constant dense<0.000000e+00> : vector<8xf32>
    %247 = vector.multi_reduction <add>, %246, %cst_81 [1] : vector<8x8xf32> to vector<8xf32>
    %248 = vector.shape_cast %247 : vector<8xf32> to vector<8x1xf32>
    %249 = tpu.reciprocal %248 {approx = true} : vector<8x1xf32> -> vector<8x1xf32>
    %250 = vector.broadcast %249 : vector<8x1xf32> to vector<8x8xf32>
    %251 = arith.mulf %246, %250 : vector<8x8xf32>
    %cst_82 = arith.constant dense<0.000000e+00> : vector<8x16xf32>
    %252 = tpu.matmul %251, %237, %cst_82 {dimension_numbers = #tpu.dot_dimension_numbers<[1], [0], [0], [1], [0, 0, 1, 1], [], []>} : vector<8x8xf32>, vector<8x16xf32>, vector<8x16xf32> -> vector<8x16xf32>
    %253 = vector.extract_strided_slice %212 {offsets = [16, 0], sizes = [16, 32], strides = [1, 1]} : vector<32x32xf32> to vector<16x32xf32>
    %cst_83 = arith.constant dense<0.000000e+00> : vector<8x32xf32>
    %254 = tpu.matmul %252, %253, %cst_83 {dimension_numbers = #tpu.dot_dimension_numbers<[1], [0], [0], [1], [0, 0, 1, 1], [], []>} : vector<8x16xf32>, vector<16x32xf32>, vector<8x32xf32> -> vector<8x32xf32>
    %255 = arith.addf %234, %254 : vector<8x32xf32>
    %cst_84 = arith.constant 0.000000e+00 : f32
    %256 = vector.broadcast %cst_84 : f32 to vector<8x32xf32>
    %257 = vector.extract_strided_slice %210 {offsets = [8, 0], sizes = [8, 16], strides = [1, 1]} : vector<16x96xf32> to vector<8x16xf32>
    %258 = vector.extract_strided_slice %210 {offsets = [8, 32], sizes = [8, 16], strides = [1, 1]} : vector<16x96xf32> to vector<8x16xf32>
    %259 = vector.extract_strided_slice %210 {offsets = [8, 64], sizes = [8, 16], strides = [1, 1]} : vector<16x96xf32> to vector<8x16xf32>
    %cst_85 = arith.constant dense<0.000000e+00> : vector<8x8xf32>
    %260 = tpu.matmul %257, %258, %cst_85 {dimension_numbers = #tpu.dot_dimension_numbers<[1], [1], [0], [0], [0, 0, 1, 0], [], []>} : vector<8x16xf32>, vector<8x16xf32>, vector<8x8xf32> -> vector<8x8xf32>
    %261 = vector.extract_strided_slice %1 {offsets = [1, 0], sizes = [1, 8], strides = [1, 1]} : vector<2x8xf32> to vector<1x8xf32>
    %262 = vector.broadcast %261 : vector<1x8xf32> to vector<8x8xf32>
    %263 = arith.addf %260, %262 : vector<8x8xf32>
    %cst_86 = arith.constant dense<0xFF800000> : vector<8xf32>
    %264 = vector.multi_reduction <maximumf>, %263, %cst_86 [1] : vector<8x8xf32> to vector<8xf32>
    %265 = vector.shape_cast %264 : vector<8xf32> to vector<8x1xf32>
    %266 = vector.broadcast %265 : vector<8x1xf32> to vector<8x8xf32>
    %267 = arith.subf %263, %266 : vector<8x8xf32>
    %268 = math.exp %267 : vector<8x8xf32>
    %cst_87 = arith.constant dense<0.000000e+00> : vector<8xf32>
    %269 = vector.multi_reduction <add>, %268, %cst_87 [1] : vector<8x8xf32> to vector<8xf32>
    %270 = vector.shape_cast %269 : vector<8xf32> to vector<8x1xf32>
    %271 = tpu.reciprocal %270 {approx = true} : vector<8x1xf32> -> vector<8x1xf32>
    %272 = vector.broadcast %271 : vector<8x1xf32> to vector<8x8xf32>
    %273 = arith.mulf %268, %272 : vector<8x8xf32>
    %cst_88 = arith.constant dense<0.000000e+00> : vector<8x16xf32>
    %274 = tpu.matmul %273, %259, %cst_88 {dimension_numbers = #tpu.dot_dimension_numbers<[1], [0], [0], [1], [0, 0, 1, 1], [], []>} : vector<8x8xf32>, vector<8x16xf32>, vector<8x16xf32> -> vector<8x16xf32>
    %275 = vector.extract_strided_slice %212 {offsets = [0, 0], sizes = [16, 32], strides = [1, 1]} : vector<32x32xf32> to vector<16x32xf32>
    %cst_89 = arith.constant dense<0.000000e+00> : vector<8x32xf32>
    %276 = tpu.matmul %274, %275, %cst_89 {dimension_numbers = #tpu.dot_dimension_numbers<[1], [0], [0], [1], [0, 0, 1, 1], [], []>} : vector<8x16xf32>, vector<16x32xf32>, vector<8x32xf32> -> vector<8x32xf32>
    %277 = arith.addf %256, %276 : vector<8x32xf32>
    %278 = vector.extract_strided_slice %210 {offsets = [8, 16], sizes = [8, 16], strides = [1, 1]} : vector<16x96xf32> to vector<8x16xf32>
    %279 = vector.extract_strided_slice %210 {offsets = [8, 48], sizes = [8, 16], strides = [1, 1]} : vector<16x96xf32> to vector<8x16xf32>
    %280 = vector.extract_strided_slice %210 {offsets = [8, 80], sizes = [8, 16], strides = [1, 1]} : vector<16x96xf32> to vector<8x16xf32>
    %cst_90 = arith.constant dense<0.000000e+00> : vector<8x8xf32>
    %281 = tpu.matmul %278, %279, %cst_90 {dimension_numbers = #tpu.dot_dimension_numbers<[1], [1], [0], [0], [0, 0, 1, 0], [], []>} : vector<8x16xf32>, vector<8x16xf32>, vector<8x8xf32> -> vector<8x8xf32>
    %282 = vector.extract_strided_slice %1 {offsets = [1, 0], sizes = [1, 8], strides = [1, 1]} : vector<2x8xf32> to vector<1x8xf32>
    %283 = vector.broadcast %282 : vector<1x8xf32> to vector<8x8xf32>
    %284 = arith.addf %281, %283 : vector<8x8xf32>
    %cst_91 = arith.constant dense<0xFF800000> : vector<8xf32>
    %285 = vector.multi_reduction <maximumf>, %284, %cst_91 [1] : vector<8x8xf32> to vector<8xf32>
    %286 = vector.shape_cast %285 : vector<8xf32> to vector<8x1xf32>
    %287 = vector.broadcast %286 : vector<8x1xf32> to vector<8x8xf32>
    %288 = arith.subf %284, %287 : vector<8x8xf32>
    %289 = math.exp %288 : vector<8x8xf32>
    %cst_92 = arith.constant dense<0.000000e+00> : vector<8xf32>
    %290 = vector.multi_reduction <add>, %289, %cst_92 [1] : vector<8x8xf32> to vector<8xf32>
    %291 = vector.shape_cast %290 : vector<8xf32> to vector<8x1xf32>
    %292 = tpu.reciprocal %291 {approx = true} : vector<8x1xf32> -> vector<8x1xf32>
    %293 = vector.broadcast %292 : vector<8x1xf32> to vector<8x8xf32>
    %294 = arith.mulf %289, %293 : vector<8x8xf32>
    %cst_93 = arith.constant dense<0.000000e+00> : vector<8x16xf32>
    %295 = tpu.matmul %294, %280, %cst_93 {dimension_numbers = #tpu.dot_dimension_numbers<[1], [0], [0], [1], [0, 0, 1, 1], [], []>} : vector<8x8xf32>, vector<8x16xf32>, vector<8x16xf32> -> vector<8x16xf32>
    %296 = vector.extract_strided_slice %212 {offsets = [16, 0], sizes = [16, 32], strides = [1, 1]} : vector<32x32xf32> to vector<16x32xf32>
    %cst_94 = arith.constant dense<0.000000e+00> : vector<8x32xf32>
    %297 = tpu.matmul %295, %296, %cst_94 {dimension_numbers = #tpu.dot_dimension_numbers<[1], [0], [0], [1], [0, 0, 1, 1], [], []>} : vector<8x16xf32>, vector<16x32xf32>, vector<8x32xf32> -> vector<8x32xf32>
    %298 = arith.addf %277, %297 : vector<8x32xf32>
    %299 = tpu.concatenate %255, %298 in 0 : vector<8x32xf32>, vector<8x32xf32> -> vector<16x32xf32>
    %300 = arith.addf %195, %299 : vector<16x32xf32>
    %301 = vector.broadcast %199 : vector<1x32xf32> to vector<16x32xf32>
    %302 = arith.addf %300, %301 : vector<16x32xf32>
    %cst_95 = arith.constant dense<0.000000e+00> : vector<16xf32>
    %303 = vector.multi_reduction <add>, %302, %cst_95 [1] : vector<16x32xf32> to vector<16xf32>
    %304 = vector.shape_cast %303 : vector<16xf32> to vector<16x1xf32>
    %cst_96 = arith.constant 3.200000e+01 : f32
    %305 = vector.broadcast %cst_96 : f32 to vector<16x1xf32>
    %306 = arith.divf %304, %305 : vector<16x1xf32>
    %307 = vector.broadcast %306 : vector<16x1xf32> to vector<16x32xf32>
    %308 = arith.subf %302, %307 : vector<16x32xf32>
    %309 = arith.mulf %308, %308 : vector<16x32xf32>
    %cst_97 = arith.constant dense<0.000000e+00> : vector<16xf32>
    %310 = vector.multi_reduction <add>, %309, %cst_97 [1] : vector<16x32xf32> to vector<16xf32>
    %311 = vector.shape_cast %310 : vector<16xf32> to vector<16x1xf32>
    %cst_98 = arith.constant 3.200000e+01 : f32
    %312 = vector.broadcast %cst_98 : f32 to vector<16x1xf32>
    %313 = arith.divf %311, %312 : vector<16x1xf32>
    %314 = vector.broadcast %306 : vector<16x1xf32> to vector<16x32xf32>
    %315 = arith.subf %302, %314 : vector<16x32xf32>
    %cst_99 = arith.constant 9.99999996E-13 : f32
    %316 = vector.broadcast %cst_99 : f32 to vector<16x1xf32>
    %317 = arith.addf %313, %316 : vector<16x1xf32>
    %318 = math.rsqrt %317 : vector<16x1xf32>
    %319 = vector.broadcast %318 : vector<16x1xf32> to vector<16x32xf32>
    %320 = arith.mulf %315, %319 : vector<16x32xf32>
    %321 = vector.broadcast %200 : vector<1x32xf32> to vector<16x32xf32>
    %322 = arith.mulf %320, %321 : vector<16x32xf32>
    %323 = vector.broadcast %201 : vector<1x32xf32> to vector<16x32xf32>
    %324 = arith.addf %322, %323 : vector<16x32xf32>
    %c1_100 = arith.constant 1 : index
    %c0_101 = arith.constant 0 : index
    %c0_102 = arith.constant 0 : index
    %325 = vector.load %arg5[%c1_100, %c0_101, %c0_102] : memref<2x32x64xf32, #tpu.memory_space<vmem>>, vector<1x32x64xf32>
    %326 = vector.shape_cast %325 : vector<1x32x64xf32> to vector<32x64xf32>
    %cst_103 = arith.constant dense<0.000000e+00> : vector<16x64xf32>
    %327 = tpu.matmul %324, %326, %cst_103 {dimension_numbers = #tpu.dot_dimension_numbers<[1], [0], [0], [1], [0, 0, 1, 1], [], []>} : vector<16x32xf32>, vector<32x64xf32>, vector<16x64xf32> -> vector<16x64xf32>
    %328 = vector.broadcast %202 : vector<1x64xf32> to vector<16x64xf32>
    %329 = arith.addf %327, %328 : vector<16x64xf32>
    %cst_104 = arith.constant 5.000000e-01 : f32
    %330 = vector.broadcast %cst_104 : f32 to vector<16x64xf32>
    %331 = arith.mulf %330, %329 : vector<16x64xf32>
    %cst_105 = arith.constant 0.707106769 : f32
    %332 = vector.broadcast %cst_105 : f32 to vector<16x64xf32>
    %333 = arith.mulf %329, %332 : vector<16x64xf32>
    %334 = math.erf %333 : vector<16x64xf32>
    %cst_106 = arith.constant 1.000000e+00 : f32
    %335 = vector.broadcast %cst_106 : f32 to vector<16x64xf32>
    %336 = arith.addf %335, %334 : vector<16x64xf32>
    %337 = arith.mulf %331, %336 : vector<16x64xf32>
    %c1_107 = arith.constant 1 : index
    %c0_108 = arith.constant 0 : index
    %c0_109 = arith.constant 0 : index
    %338 = vector.load %arg6[%c1_107, %c0_108, %c0_109] : memref<2x64x32xf32, #tpu.memory_space<vmem>>, vector<1x64x32xf32>
    %339 = vector.shape_cast %338 : vector<1x64x32xf32> to vector<64x32xf32>
    %cst_110 = arith.constant dense<0.000000e+00> : vector<16x32xf32>
    %340 = tpu.matmul %337, %339, %cst_110 {dimension_numbers = #tpu.dot_dimension_numbers<[1], [0], [0], [1], [0, 0, 1, 1], [], []>} : vector<16x64xf32>, vector<64x32xf32>, vector<16x32xf32> -> vector<16x32xf32>
    %341 = vector.broadcast %203 : vector<1x32xf32> to vector<16x32xf32>
    %342 = arith.addf %340, %341 : vector<16x32xf32>
    %343 = arith.addf %324, %342 : vector<16x32xf32>
    %cst_111 = arith.constant dense<0.000000e+00> : vector<16xf32>
    %344 = vector.multi_reduction <add>, %343, %cst_111 [1] : vector<16x32xf32> to vector<16xf32>
    %345 = vector.shape_cast %344 : vector<16xf32> to vector<16x1xf32>
    %cst_112 = arith.constant 3.200000e+01 : f32
    %346 = vector.broadcast %cst_112 : f32 to vector<16x1xf32>
    %347 = arith.divf %345, %346 : vector<16x1xf32>
    %348 = vector.broadcast %347 : vector<16x1xf32> to vector<16x32xf32>
    %349 = arith.subf %343, %348 : vector<16x32xf32>
    %350 = arith.mulf %349, %349 : vector<16x32xf32>
    %cst_113 = arith.constant dense<0.000000e+00> : vector<16xf32>
    %351 = vector.multi_reduction <add>, %350, %cst_113 [1] : vector<16x32xf32> to vector<16xf32>
    %352 = vector.shape_cast %351 : vector<16xf32> to vector<16x1xf32>
    %cst_114 = arith.constant 3.200000e+01 : f32
    %353 = vector.broadcast %cst_114 : f32 to vector<16x1xf32>
    %354 = arith.divf %352, %353 : vector<16x1xf32>
    %355 = vector.broadcast %347 : vector<16x1xf32> to vector<16x32xf32>
    %356 = arith.subf %343, %355 : vector<16x32xf32>
    %cst_115 = arith.constant 9.99999996E-13 : f32
    %357 = vector.broadcast %cst_115 : f32 to vector<16x1xf32>
    %358 = arith.addf %354, %357 : vector<16x1xf32>
    %359 = math.rsqrt %358 : vector<16x1xf32>
    %360 = vector.broadcast %359 : vector<16x1xf32> to vector<16x32xf32>
    %361 = arith.mulf %356, %360 : vector<16x32xf32>
    %362 = vector.broadcast %204 : vector<1x32xf32> to vector<16x32xf32>
    %363 = arith.mulf %361, %362 : vector<16x32xf32>
    %364 = vector.broadcast %205 : vector<1x32xf32> to vector<16x32xf32>
    %365 = arith.addf %363, %364 : vector<16x32xf32>
    %366 = vector.extract_strided_slice %365 {offsets = [0, 0], sizes = [1, 32], strides = [1, 1]} : vector<16x32xf32> to vector<1x32xf32>
    %367 = vector.extract_strided_slice %365 {offsets = [8, 0], sizes = [1, 32], strides = [1, 1]} : vector<16x32xf32> to vector<1x32xf32>
    %368 = tpu.concatenate %366, %367 in 0 : vector<1x32xf32>, vector<1x32xf32> -> vector<2x32xf32>
    %c0_116 = arith.constant 0 : index
    %c0_117 = arith.constant 0 : index
    %369 = vector.load %arg8[%c0_116, %c0_117] : memref<32x32xf32, #tpu.memory_space<vmem>>, vector<32x32xf32>
    %cst_118 = arith.constant dense<0.000000e+00> : vector<2x32xf32>
    %370 = tpu.matmul %368, %369, %cst_118 {dimension_numbers = #tpu.dot_dimension_numbers<[1], [0], [0], [1], [0, 0, 1, 1], [], []>} : vector<2x32xf32>, vector<32x32xf32>, vector<2x32xf32> -> vector<2x32xf32>
    %c0_119 = arith.constant 0 : index
    %c0_120 = arith.constant 0 : index
    %371 = vector.load %arg9[%c0_119, %c0_120] : memref<3x32xf32, #tpu.memory_space<vmem>>, vector<1x32xf32>
    %372 = vector.broadcast %371 : vector<1x32xf32> to vector<2x32xf32>
    %373 = arith.addf %370, %372 : vector<2x32xf32>
    %374 = math.tanh %373 : vector<2x32xf32>
    %c1_121 = arith.constant 1 : index
    %c0_122 = arith.constant 0 : index
    %375 = vector.load %arg9[%c1_121, %c0_122] : memref<3x32xf32, #tpu.memory_space<vmem>>, vector<1x32xf32>
    %c2 = arith.constant 2 : index
    %c0_123 = arith.constant 0 : index
    %376 = vector.load %arg9[%c2, %c0_123] : memref<3x32xf32, #tpu.memory_space<vmem>>, vector<1x1xf32>
    %377 = vector.broadcast %375 : vector<1x32xf32> to vector<2x32xf32>
    %378 = arith.mulf %374, %377 : vector<2x32xf32>
    %cst_124 = arith.constant dense<0.000000e+00> : vector<2xf32>
    %379 = vector.multi_reduction <add>, %378, %cst_124 [1] : vector<2x32xf32> to vector<2xf32>
    %380 = vector.shape_cast %379 : vector<2xf32> to vector<2x1xf32>
    %381 = vector.broadcast %376 : vector<1x1xf32> to vector<2x1xf32>
    %382 = arith.addf %380, %381 : vector<2x1xf32>
    %c0_125 = arith.constant 0 : index
    %c0_126 = arith.constant 0 : index
    %383 = vector.load %arg10[%c0_125, %c0_126] : memref<2x1xf32, #tpu.memory_space<vmem>>, vector<2x1xf32>
    tpu.vector_store %arg10[%c0_125, %c0_126], %382 {strides = array<i32>} : memref<2x1xf32, #tpu.memory_space<vmem>>, vector<2x1xf32>,
    return
  }
}

</mosaic_0001>

<bundles_post_ra>
// kernel: bert_vowel_density_forward.1
= control target key start
LH: loop header
LB: loop body
LE: loop exit
PB: predicated region body
PF: predicated region fallthrough
CT: control target
= control target key end

     0   :  { %vm40_vm0 = vcmask 261120   ;;  %v3419_v36 = vmov 0.0   ;;  %v85_v37 = vlaneseq  ;;  %vm3420_vm1 = vmmov 0   ;;  %s3421_s29 = smov 80   ;;  %s3422_s30 = smov 96   ;;  %s3952_s0 = inlined_call_operand.vmem [shape: f32[16,32], index: 0, kind: input, shape index: {}]   ;;  %s3953_s3 = inlined_call_operand.vmem [shape: f32[2,32,96], index: 3, kind: input, shape index: {}]   ;;  %s3954_s2 = inlined_call_operand.vmem [shape: f32[2,32], index: 2, kind: input, shape index: {}]   ;;  %s3955_s7 = inlined_call_operand.vmem [shape: f32[2,8,128], index: 7, kind: input, shape index: {}]   ;;  %s3956_s1 = inlined_call_operand.vmem [shape: f32[2,8], index: 1, kind: input, shape index: {}]   ;;  %s3957_s4 = inlined_call_operand.vmem [shape: f32[2,32,32], index: 4, kind: input, shape index: {}]   ;;  %s3958_s5 = inlined_call_operand.vmem [shape: f32[2,32,64], index: 5, kind: input, shape index: {}]   ;;  %s3959_s6 = inlined_call_operand.vmem [shape: f32[2,64,32], index: 6, kind: input, shape index: {}]   ;;  %s3960_s8 = inlined_call_operand.vmem [shape: f32[32,32], index: 8, kind: input, shape index: {}]   ;;  %s3961_s9 = inlined_call_operand.vmem [shape: f32[3,32], index: 9, kind: input, shape index: {}]   ;;  %s3962_s10 = inlined_call_operand.vmem [shape: f32[2,1], index: 10, kind: output, shape index: {}]  }
   0x1   :  { %v35_v0 = vld [vmem:[%s3952_s0] sm:$0xff]  ;;  %v36_v1 = vld [vmem:[%s3952_s0 + $0x8] sm:$0xff]  ;;  %v83_v16 = vld [vmem:[%s3953_s3 + $0x10] sm:$0xff]  ;;  %3037 = vmatprep.subr.mxu1 %v3419_v36  ;;  %3039 = vmatprep.mubr.msk.f32.mxu1 %vm3420_vm1, %v3419_v36  ;;  %s3423_s11 = smov 112   ;;  %vm181_vm2 = vcmask 130048   ;;  %vm256_vm3 = vcmask 64512  }
   0x2   :  { %v41_v2 = vsel %vm40_vm0, %v35_v0, 0.0  ;;  %v44_v3 = vsel %vm40_vm0, %v36_v1, 0.0  ;;  %v81_v14 = vld [vmem:[%s3953_s3] sm:$0xff]  ;;  %v82_v15 = vld [vmem:[%s3953_s3 + $0x8] sm:$0xff]  ;;  %v84_v18 = vld [vmem:[%s3953_s3 + $0x18] sm:$0xff]  ;;  %v3520_v38 = vshrl.u32 %v85_v37, 7 }
   0x3   :  { %42 = vadd.xlane.f32.xlu0 %v41_v2  ;;  %v3255_v17 = vpack.c.bf16 %v82_v15, %v81_v14  ;;  %v3259_v19 = vpack.c.bf16 %v84_v18, %v83_v16  ;;  %v2850_v27 = vld [vmem:[%s3954_s2] ss:$0 sm:$0xff]  ;;  %v2851_v29 = vld [vmem:[%s3954_s2 + $0x1] ss:$0 sm:$0xff]  ;;  %s3425_s14 = smov 48   ;;  %v171_v15 = vld [vmem:[%s3957_s4 + $0x8] sm:$0xff] }
   0x4   :  { %v3527_v39 = vsub.s32 0, %v3520_v38  ;;  %v3532_v40 = vld [vmem:[%s3955_s7] sm:$0xff]  ;;  %vm1291_vm4 = vcmask 523264   ;;  %vm2743_vm5 = vcmask 1040384   ;;  %vm2835_vm6 = vcmask 254976  }
   0x5   :  { %3256 = vmatprep.subr.bf16.mxu0 %v3255_v17  ;;  %v3553_v49 = vld [vmem:[%s3956_s1] sm:$0x3]  ;;  %s3424_s1 = smov 64   ;;  %vm2844_vm7 = vcmask 1024  }
   0x6   :  { %3258 = vmatpush3.bf16.msra.mxu0 %v3255_v17  ;;  %v88_v41 = vrot.slane %v3532_v40, %v3527_v39  ;;  %v3557_v50 = vrot.slane %v3553_v49, %v3527_v39  ;;  %v170_v14 = vld [vmem:[%s3957_s4] sm:$0xff] }
   0x7   :  { %45 = vadd.xlane.f32.xlu0 %v44_v3  ;;  %3260 = vmatprep.subr.bf16.mxu0 %v3259_v19  ;;  %v3591_v18 = vpack.c.bf16 %v171_v15, %v170_v14 }
   0xa   :  { %3262 = vmatpush3.bf16.msra.mxu0 %v3259_v19 }
   0xb   :  { %3047 = vmatprep.subr.mxu0 %v3419_v36 }
  0x90   :  { %v43_v4 = vpop.xlane.xlu0 %42 }
  0x91   :  { %v48_v5 = vmul.f32 0.03125, %v43_v4 }
  0x93   :  { %v50_v6 = vsub.f32 %v35_v0, %v48_v5 }
  0x94   :  { %v46_v7 = vpop.xlane.xlu0 %45 }
  0x95   :  { %v49_v8 = vmul.f32 0.03125, %v46_v7  ;;  %v52_v9 = vmul.f32 %v50_v6, %v50_v6  ;;  %v172_v7 = vld [vmem:[%s3957_s4 + $0x10] sm:$0xff] }
  0x97   :  { %v51_v10 = vsub.f32 %v36_v1, %v49_v8  ;;  %v54_v11 = vsel %vm40_vm0, %v52_v9, 0.0  ;;  %v173_v8 = vld [vmem:[%s3957_s4 + $0x18] sm:$0xff] }
  0x98   :  { %55 = vadd.xlane.f32.xlu1 %v54_v11  ;;  %v3264_v9 = vpack.c.bf16 %v173_v8, %v172_v7 }
  0x99   :  { %v53_v12 = vmul.f32 %v51_v10, %v51_v10 }
  0x9b   :  { %v57_v13 = vsel %vm40_vm0, %v53_v12, 0.0 }
  0x9c   :  { %58 = vadd.xlane.f32.xlu1 %v57_v13 }
 0x125   :  { %v56_v20 = vpop.xlane.xlu1 %55 }
 0x126   :  { %v60_v21 = vmul.f32 0.03125, %v56_v20 }
 0x128   :  { %v62_v22 = vadd.f32 1e-12, %v60_v21 }
 0x129   :  { %v59_v23 = vpop.xlane.xlu1 %58 }
 0x12a   :  { %3357 = vrsqrt.f32 %v62_v22  ;;  %v61_v24 = vmul.f32 0.03125, %v59_v23 }
 0x12c   :  { %v63_v25 = vadd.f32 1e-12, %v61_v24 }
 0x12e   :  { %3359 = vrsqrt.f32 %v63_v25 }
 0x134   :  { %v3358_v26 = vpop.eup %3357 }
 0x135   :  { %v66_v28 = vmul.f32 %v3358_v26, %v50_v6  ;;  %v3426_v6 = vmov 0.0|0.0  }
 0x137   :  { %v72_v30 = vmul.f32 %v2850_v27, %v66_v28 }
 0x138   :  { %v3360_v31 = vpop.eup %3359 }
 0x139   :  { %v67_v32 = vmul.f32 %v3360_v31, %v51_v10  ;;  %v3510_v33 = vadd.f32 %v2851_v29, %v72_v30 }
 0x13b   :  { %v73_v34 = vmul.f32 %v2850_v27, %v67_v32  ;;  %3034 = vmatprep.mubr.msk.f32.mxu0 %vm40_vm0, %v3510_v33 }
 0x13d   :  { %v3514_v35 = vadd.f32 %v2851_v29, %v73_v34  ;;  %v3617_v29 = vsub.s32 1, %v3520_v38 }
 0x13f   :  { %3035 = vmatmul.mubr.msk.f32.vlgmr.msra.gmra.mrb[0].mxu0 %vm40_vm0, %v3514_v35  ;;  %v3621_v34 = vrot.slane %v3553_v49, %v3617_v29 }
 0x140   :  { %3049 = vmatprep.mubr.msk.f32.mxu0 %vm3420_vm1, %v3419_v36 }
 0x212   :  { %v3036_v42 = vpop.f32.mrb[0].mxu0 }
 0x213   :  { %v3536_v43 = vadd.f32 %v3036_v42, %v88_v41  ;;  %v161_v44 = vpop.f32.mrb[1].mxu0 }
 0x214   :  { %v162_v45 = vadd.f32 %v161_v44, %v88_v41 }
 0x216   :  { %346 = vrot.lane.b32.xlu1 %v162_v45, %s3421_s29  ;;  %179 = vrot.lane.b32.xlu0 %v162_v45, %s3422_s30 }
 0x21a   :  { %344 = vrot.lane.b32.xlu1 %v162_v45, %s3423_s11 }
 0x288   :  { %v347_v46 = vpop.permute.xlu1 %346  ;;  %v180_v47 = vpop.permute.xlu0 %179 }
 0x289   :  { %3038 = vmatpush3.xpose.msk.msra.mxu1 %vm181_vm2, %v180_v47  ;;  %3048 = vmatpush3.xpose.msk.msra.mxu0 %vm181_vm2, %v347_v46 }
 0x28a   :  { %3042 = vmatprep.subr.mxu1 %v3419_v36  ;;  %3263 = vmatprep.subr.bf16.mxu0 %v3426_v6 }
 0x28c   :  { %v345_v48 = vpop.permute.xlu1 %344  ;;  %3040 = vmatmul.mubr.msk.f32.vlgmr.msra.gmra.mrb[0].mxu1 %vm181_vm2, %v162_v45 }
 0x28d   :  { %3050 = vmatmul.mubr.msk.f32.vlgmr.msra.gmra.mrb[2].mxu0 %vm181_vm2, %v345_v48  ;;  %3044 = vmatprep.mubr.msk.f32.mxu1 %vm3420_vm1, %v3419_v36 }
 0x28e   :  { %3061 = vmatprep.mubr.msk.f32.mxu0 %vm3420_vm1, %v3419_v36  ;;  %3265 = vmatpush3.bf16.msra.mxu0 %v3264_v9 }
 0x28f   :  { %3071 = vmatprep.subr.mxu0 %v3419_v36 }
 0x35f   :  { %v252_v51 = vpop.f32.mrb[0].mxu1 }
 0x360   :  { %v253_v52 = vadd.f32 %v252_v51, %v3557_v50  ;;  %v3041_v53 = vpop.f32.mrb[1].mxu1  ;;  %v418_v54 = vpop.f32.mrb[2].mxu0  ;;  %v1139_v51 = vrot.slane %v3532_v40, %v3617_v29 }
 0x361   :  { %v419_v55 = vadd.f32 %v418_v54, %v3557_v50  ;;  %v3051_v56 = vpop.f32.mrb[3].mxu0 }
 0x362   :  { %v257_v57 = vsel %vm256_vm3, %v253_v52, -inf }
 0x363   :  { %258 = vmax.xlane.f32.xlu1 %v257_v57  ;;  %v422_v58 = vsel %vm256_vm3, %v419_v55, -inf }
 0x364   :  { %423 = vmax.xlane.f32.xlu0 %v422_v58 }
 0x374   :  { %268 = vrot.lane.b32.xlu1 %v162_v45, %s3424_s1 }
 0x378   :  { %660 = vrot.lane.b32.xlu1 %v3536_v43, %s3422_s30 }
 0x37c   :  { %825 = vrot.lane.b32.xlu1 %v3536_v43, %s3421_s29 }
 0x380   :  { %823 = vrot.lane.b32.xlu1 %v3536_v43, %s3423_s11 }
 0x3f0   :  { %v259_v59 = vpop.xlane.xlu1 %258 }
 0x3f1   :  { %v260_v60 = vsub.f32 %v253_v52, %v259_v59  ;;  %v424_v61 = vpop.xlane.xlu0 %423 }
 0x3f2   :  { %v425_v62 = vsub.f32 %v419_v55, %v424_v61 }
 0x3f3   :  { %v261_v63 = vmul.f32 1.442695, %v260_v60 }
 0x3f4   :  { %v426_v0 = vmul.f32 1.442695, %v425_v62  ;;  %v269_v1 = vpop.permute.xlu1 %268 }
 0x3f5   :  { %3361 = vpow2.f32 %v261_v63  ;;  %3043 = vmatpush3.msra.mxu1 %v269_v1 }
 0x3f6   :  { %3052 = vmatprep.subr.mxu1 %v3419_v36  ;;  %3363 = vpow2.f32 %v426_v0 }
 0x3f8   :  { %v661_v20 = vpop.permute.xlu1 %660 }
 0x3fc   :  { %v826_v25 = vpop.permute.xlu1 %825 }
 0x3ff   :  { %v3362_v2 = vpop.eup %3361 }
 0x400   :  { %v263_v3 = vsel %vm256_vm3, %v3362_v2, 0.0  ;;  %v3364_v4 = vpop.eup %3363  ;;  %v824_v26 = vpop.permute.xlu1 %823 }
 0x401   :  { %264 = vadd.xlane.f32.xlu0 %v263_v3  ;;  %v428_v5 = vsel %vm256_vm3, %v3364_v4, 0.0 }
 0x405   :  { %429 = vadd.xlane.f32.xlu0 %v428_v5 }
 0x41b   :  { %433 = vrot.lane.b32.xlu0 %v162_v45, %s3425_s14 }
 0x48e   :  { %v265_v10 = vpop.xlane.xlu0 %264 }
 0x48f   :  { %3365 = vrcp.f32 %v265_v10 }
 0x492   :  { %v430_v11 = vpop.xlane.xlu0 %429 }
 0x493   :  { %3367 = vrcp.f32 %v430_v11 }
 0x496   :  { %v434_v16 = vpop.permute.xlu0 %433 }
 0x499   :  { %v3366_v12 = vpop.eup %3365 }
 0x49a   :  { %v267_v13 = vmul.f32 %v3366_v12, %v3362_v2 }
 0x49c   :  { %3045 = vmatmul.mubr.msk.f32.vlgmr.msra.gmra.mrb[2].mxu1 %vm256_vm3, %v267_v13 }
 0x49d   :  { %v3368_v17 = vpop.eup %3367  ;;  %3053 = vmatpush3.msra.mxu1 %v434_v16  ;;  %3054 = vmatprep.mubr.msk.f32.mxu1 %vm3420_vm1, %v3419_v36 }
 0x49e   :  { %v432_v19 = vmul.f32 %v3368_v17, %v3364_v4  ;;  %3266 = vmatprep.subr.bf16.mxu1 %v3426_v6 }
 0x4a0   :  { %3055 = vmatmul.mubr.msk.f32.vlgmr.msra.gmra.mrb[4].mxu1 %vm256_vm3, %v432_v19 }
 0x4a1   :  { %3268 = vmatpush3.bf16.msra.mxu1 %v3591_v18  ;;  %3068 = vmatprep.mubr.msk.f32.mxu1 %vm3420_vm1, %v3419_v36 }
 0x4a2   :  { %3076 = vmatprep.subr.mxu1 %v3419_v36 }
 0x56f   :  { %v340_v21 = vpop.f32.mrb[2].mxu1 }
 0x570   :  { %v3046_v22 = vpop.f32.mrb[3].mxu1  ;;  %3069 = vmatmul.mubr.msk.f32.vlgmr.msra.gmra.mrb[6].mxu1 %vm181_vm2, %v340_v21 }
 0x571   :  { %3078 = vmatprep.mubr.msk.f32.mxu1 %vm3420_vm1, %v3419_v36 }
 0x573   :  { %v505_v23 = vpop.f32.mrb[4].mxu1 }
 0x574   :  { %v3056_v24 = vpop.f32.mrb[5].mxu1  ;;  %3062 = vmatmul.mubr.msk.f32.vlgmr.msra.gmra.mrb[4].mxu0 %vm181_vm2, %v505_v23 }
 0x575   :  { %3072 = vmatpush3.xpose.msk.msra.mxu0 %vm181_vm2, %v661_v20  ;;  %3073 = vmatprep.mubr.msk.f32.mxu0 %vm3420_vm1, %v3419_v36 }
 0x576   :  { %3081 = vmatprep.subr.mxu0 %v3419_v36 }
 0x578   :  { %3074 = vmatmul.mubr.msk.f32.vlgmr.msra.gmra.mrb[6].mxu0 %vm181_vm2, %v3536_v43 }
 0x579   :  { %3082 = vmatpush3.xpose.msk.msra.mxu0 %vm181_vm2, %v826_v25  ;;  %3083 = vmatprep.mubr.msk.f32.mxu0 %vm3420_vm1, %v3419_v36 }
 0x57a   :  { %3269 = vmatprep.subr.bf16.mxu0 %v3426_v6 }
 0x57c   :  { %3084 = vmatmul.mubr.msk.f32.vlgmr.msra.gmra.mrb[8].mxu0 %vm181_vm2, %v824_v26 }
 0x57d   :  { %3271 = vmatpush3.bf16.msra.mxu0 %v3264_v9  ;;  %3095 = vmatprep.mubr.msk.f32.mxu0 %vm3420_vm1, %v3419_v36 }
 0x643   :  { %v651_v27 = vpop.f32.mrb[6].mxu1 }
 0x644   :  { %v3070_v28 = vpop.f32.mrb[7].mxu1 }
 0x647   :  { %v578_v30 = vpop.f32.mrb[4].mxu0 }
 0x648   :  { %v652_v31 = vadd.f32 %v651_v27, %v578_v30  ;;  %v3063_v32 = vpop.f32.mrb[5].mxu0 }
 0x64a   :  { %v1134_v49 = vadd.f32 %v652_v31, %v3510_v33 }
 0x64b   :  { %v732_v37 = vpop.f32.mrb[6].mxu0 }
 0x64c   :  { %v733_v41 = vadd.f32 %v732_v37, %v3621_v34  ;;  %v3075_v42 = vpop.f32.mrb[7].mxu0  ;;  %v1140_v52 = vadd.f32 %v1139_v51, %v1134_v49  ;;  %v1176_v37 = vsub.s32 3, %v3520_v38  ;;  %v1181_v49 = vld [vmem:[%s3958_s5 + $0x8] sm:$0xff] }
 0x64e   :  { %v736_v44 = vsel %vm256_vm3, %v733_v41, -inf  ;;  %v1142_v53 = vsel %vm40_vm0, %v1140_v52, 0.0 }
 0x64f   :  { %737 = vmax.xlane.f32.xlu0 %v736_v44  ;;  %v897_v45 = vpop.f32.mrb[8].mxu0 }
 0x650   :  { %v898_v46 = vadd.f32 %v897_v45, %v3621_v34  ;;  %v3085_v47 = vpop.f32.mrb[9].mxu0  ;;  %v1177_v45 = vrot.slane %v3532_v40, %v1176_v37 }
 0x652   :  { %v901_v48 = vsel %vm256_vm3, %v898_v46, -inf }
 0x653   :  { %902 = vmax.xlane.f32.xlu1 %v901_v48  ;;  %v1180_v48 = vld [vmem:[%s3958_s5] sm:$0xff] }
 0x664   :  { %912 = vrot.lane.b32.xlu1 %v3536_v43, %s3425_s14 }
 0x688   :  { %1143 = vadd.xlane.f32.xlu1 %v1142_v53  ;;  %v1183_v53 = vld [vmem:[%s3958_s5 + $0x18] sm:$0xff] }
 0x6dc   :  { %v738_v54 = vpop.xlane.xlu0 %737 }
 0x6dd   :  { %v739_v55 = vsub.f32 %v733_v41, %v738_v54 }
 0x6df   :  { %v740_v56 = vmul.f32 1.442695, %v739_v55 }
 0x6e0   :  { %v903_v57 = vpop.xlane.xlu1 %902 }
 0x6e1   :  { %3369 = vpow2.f32 %v740_v56  ;;  %v904_v58 = vsub.f32 %v898_v46, %v903_v57 }
 0x6e3   :  { %v905_v59 = vmul.f32 1.442695, %v904_v58 }
 0x6e4   :  { %v913_v4 = vpop.permute.xlu1 %912 }
 0x6e5   :  { %3371 = vpow2.f32 %v905_v59 }
 0x6eb   :  { %v3370_v60 = vpop.eup %3369 }
 0x6ec   :  { %v742_v61 = vsel %vm256_vm3, %v3370_v60, 0.0 }
 0x6ed   :  { %743 = vadd.xlane.f32.xlu0 %v742_v61 }
 0x6ef   :  { %v3372_v33 = vpop.eup %3371 }
 0x6f0   :  { %v907_v62 = vsel %vm256_vm3, %v3372_v33, 0.0 }
 0x6f1   :  { %908 = vadd.xlane.f32.xlu0 %v907_v62  ;;  %v1280_v62 = vld [vmem:[%s3959_s6 + $0x8] sm:$0xff] }
 0x707   :  { %747 = vrot.lane.b32.xlu0 %v3536_v43, %s3424_s1 }
 0x715   :  { %v1144_v11 = vpop.xlane.xlu1 %1143 }
 0x716   :  { %v1148_v14 = vmul.f32 0.03125, %v1144_v11 }
 0x718   :  { %v1150_v19 = vsub.f32 %v1140_v52, %v1148_v14  ;;  %v1182_v52 = vld [vmem:[%s3958_s5 + $0x10] sm:$0xff] }
 0x719   :  { %v3279_v54 = vpack.c.bf16 %v1183_v53, %v1182_v52 }
 0x71a   :  { %v1152_v22 = vmul.f32 %v1150_v19, %v1150_v19 }
 0x71c   :  { %v1154_v23 = vsel %vm40_vm0, %v1152_v22, 0.0 }
 0x77a   :  { %v744_v63 = vpop.xlane.xlu0 %743 }
 0x77b   :  { %3373 = vrcp.f32 %v744_v63 }
 0x77e   :  { %v909_v0 = vpop.xlane.xlu0 %908 }
 0x77f   :  { %3375 = vrcp.f32 %v909_v0  ;;  %v1281_v0 = vld [vmem:[%s3959_s6 + $0x10] sm:$0xff] }
 0x782   :  { %v748_v1 = vpop.permute.xlu0 %747 }
 0x783   :  { %3077 = vmatpush3.msra.mxu1 %v748_v1  ;;  %v1282_v1 = vld [vmem:[%s3959_s6 + $0x18] sm:$0xff] }
 0x784   :  { %3086 = vmatprep.subr.mxu1 %v3419_v36 }
 0x785   :  { %v3374_v2 = vpop.eup %3373 }
 0x786   :  { %v746_v3 = vmul.f32 %v3374_v2, %v3370_v60  ;;  %v3287_v2 = vpack.c.bf16 %v1282_v1, %v1281_v0 }
 0x788   :  { %3079 = vmatmul.mubr.msk.f32.vlgmr.msra.gmra.mrb[8].mxu1 %vm256_vm3, %v746_v3  ;;  %v1283_v3 = vld [vmem:[%s3959_s6 + $0x20] sm:$0xff] }
 0x789   :  { %v3376_v5 = vpop.eup %3375  ;;  %3087 = vmatpush3.msra.mxu1 %v913_v4  ;;  %3088 = vmatprep.mubr.msk.f32.mxu1 %vm3420_vm1, %v3419_v36  ;;  %v1284_v4 = vld [vmem:[%s3959_s6 + $0x28] sm:$0xff] }
 0x78a   :  { %v911_v7 = vmul.f32 %v3376_v5, %v3372_v33  ;;  %3272 = vmatprep.subr.bf16.mxu1 %v3426_v6  ;;  %v1279_v33 = vld [vmem:[%s3959_s6] sm:$0xff]  ;;  %v3291_v5 = vpack.c.bf16 %v1284_v4, %v1283_v3  ;;  %v1403_v3 = vsub.s32 6, %v3520_v38  ;;  %v1409_v4 = vsub.s32 7, %v3520_v38 }
 0x78b   :  { %v3283_v63 = vpack.c.bf16 %v1280_v62, %v1279_v33 }
 0x78c   :  { %3089 = vmatmul.mubr.msk.f32.vlgmr.msra.gmra.mrb[10].mxu1 %vm256_vm3, %v911_v7  ;;  %v1285_v7 = vld [vmem:[%s3959_s6 + $0x30] sm:$0xff] }
 0x78d   :  { %3274 = vmatpush3.bf16.msra.mxu1 %v3591_v18  ;;  %3102 = vmatprep.mubr.msk.f32.mxu1 %vm3420_vm1, %v3419_v36 }
 0x78e   :  { %3284 = vmatprep.subr.bf16.mxu1 %v3283_v63 }
 0x85b   :  { %v819_v43 = vpop.f32.mrb[8].mxu1 }
 0x85c   :  { %v3080_v8 = vpop.f32.mrb[9].mxu1  ;;  %3103 = vmatmul.mubr.msk.f32.vlgmr.msra.gmra.mrb[12].mxu1 %vm181_vm2, %v819_v43  ;;  %v1286_v43 = vld [vmem:[%s3959_s6 + $0x38] sm:$0xff] }
 0x85d   :  { %3286 = vmatpush3.bf16.msra.mxu1 %v3283_v63  ;;  %v3295_v8 = vpack.c.bf16 %v1286_v43, %v1285_v7 }
 0x85e   :  { %3288 = vmatprep.subr.bf16.mxu1 %v3287_v2 }
 0x85f   :  { %v984_v9 = vpop.f32.mrb[10].mxu1 }
 0x860   :  { %v3090_v10 = vpop.f32.mrb[11].mxu1  ;;  %3096 = vmatmul.mubr.msk.f32.vlgmr.msra.gmra.mrb[10].mxu0 %vm181_vm2, %v984_v9  ;;  %v1186_v9 = vsub.s32 4, %v3520_v38 }
 0x861   :  { %3290 = vmatpush3.bf16.msra.mxu1 %v3287_v2 }
 0x862   :  { %3292 = vmatprep.subr.bf16.mxu1 %v3291_v5  ;;  %v1187_v10 = vrot.slane %v3532_v40, %v1186_v9 }
 0x865   :  { %3294 = vmatpush3.bf16.msra.mxu1 %v3291_v5  ;;  %v1404_v5 = vrot.slane %v3532_v40, %v1403_v3 }
 0x866   :  { %3296 = vmatprep.subr.bf16.mxu1 %v3295_v8 }
 0x869   :  { %3298 = vmatpush3.bf16.msra.mxu1 %v3295_v8 }
 0x86a   :  { %3151 = vmatprep.subr.mxu1 %v3419_v36 }
 0x92f   :  { %v1130_v12 = vpop.f32.mrb[12].mxu1 }
 0x930   :  { %v3104_v13 = vpop.f32.mrb[13].mxu1 }
 0x933   :  { %v1057_v15 = vpop.f32.mrb[10].mxu0 }
 0x934   :  { %v1131_v16 = vadd.f32 %v1130_v12, %v1057_v15  ;;  %v3097_v17 = vpop.f32.mrb[11].mxu0 }
 0x936   :  { %v1135_v18 = vadd.f32 %v1131_v16, %v3514_v35  ;;  %v1170_v35 = vsub.s32 2, %v3520_v38 }
 0x938   :  { %v1141_v20 = vadd.f32 %v1139_v51, %v1135_v18  ;;  %v1171_v41 = vrot.slane %v3532_v40, %v1170_v35  ;;  %v3275_v51 = vpack.c.bf16 %v1181_v49, %v1180_v48 }
 0x93a   :  { %v1145_v21 = vsel %vm40_vm0, %v1141_v20, 0.0  ;;  %3276 = vmatprep.subr.bf16.mxu0 %v3275_v51 }
 0x93b   :  { %1146 = vadd.xlane.f32.xlu0 %v1145_v21  ;;  %3278 = vmatpush3.bf16.msra.mxu0 %v3275_v51 }
 0x93c   :  { %3280 = vmatprep.subr.bf16.mxu0 %v3279_v54 }
 0x93f   :  { %1155 = vadd.xlane.f32.xlu0 %v1154_v23  ;;  %3282 = vmatpush3.bf16.msra.mxu0 %v3279_v54 }
 0x9c8   :  { %v1147_v24 = vpop.xlane.xlu0 %1146 }
 0x9c9   :  { %v1149_v25 = vmul.f32 0.03125, %v1147_v24 }
 0x9cb   :  { %v1151_v26 = vsub.f32 %v1141_v20, %v1149_v25  ;;  %v1289_v25 = vsub.s32 5, %v3520_v38  ;;  %v2919_v38 = vld [vmem:[%s3961_s9 + $0x1] ss:$0 sm:$0xff] }
 0x9cc   :  { %v1156_v27 = vpop.xlane.xlu0 %1155 }
 0x9cd   :  { %v1160_v28 = vmul.f32 0.03125, %v1156_v27  ;;  %v1153_v30 = vmul.f32 %v1151_v26, %v1151_v26 }
 0x9cf   :  { %v1162_v31 = vadd.f32 1e-12, %v1160_v28  ;;  %v1157_v32 = vsel %vm40_vm0, %v1153_v30, 0.0 }
 0x9d0   :  { %1158 = vadd.xlane.f32.xlu1 %v1157_v32 }
 0x9d1   :  { %3377 = vrsqrt.f32 %v1162_v31 }
 0x9db   :  { %v3378_v42 = vpop.eup %3377 }
 0x9dc   :  { %v1166_v44 = vmul.f32 %v3378_v42, %v1150_v19 }
 0x9de   :  { %v1172_v46 = vmul.f32 %v1171_v41, %v1166_v44 }
 0x9e0   :  { %v3660_v47 = vadd.f32 %v1177_v45, %v1172_v46 }
 0x9e2   :  { %3113 = vmatprep.mubr.msk.f32.mxu0 %vm40_vm0, %v3660_v47 }
 0xa5d   :  { %v1159_v55 = vpop.xlane.xlu1 %1158 }
 0xa5e   :  { %v1161_v56 = vmul.f32 0.03125, %v1159_v55 }
 0xa60   :  { %v1163_v57 = vadd.f32 1e-12, %v1161_v56 }
 0xa62   :  { %3379 = vrsqrt.f32 %v1163_v57  ;;  %v2876_v57 = vld [vmem:[%s3953_s3 + $0x28] sm:$0xff] }
 0xa6c   :  { %v3380_v58 = vpop.eup %3379 }
 0xa6d   :  { %v1167_v59 = vmul.f32 %v3380_v58, %v1151_v26  ;;  %v1290_v26 = vrot.slane %v3532_v40, %v1289_v25 }
 0xa6f   :  { %v1173_v60 = vmul.f32 %v1171_v41, %v1167_v59  ;;  %v2877_v59 = vld [vmem:[%s3953_s3 + $0x30] sm:$0xff] }
 0xa71   :  { %v1179_v61 = vadd.f32 %v1177_v45, %v1173_v60  ;;  %v2878_v60 = vld [vmem:[%s3953_s3 + $0x38] sm:$0xff] }
 0xa73   :  { %3114 = vmatmul.mubr.msk.f32.vlgmr.msra.gmra.mrb[12].mxu0 %vm40_vm0, %v1179_v61 }
 0xb46   :  { %v3115_v11 = vpop.f32.mrb[12].mxu0 }
 0xb47   :  { %v1266_v12 = vadd.f32 %v3115_v11, %v1187_v10  ;;  %v1260_v13 = vpop.f32.mrb[13].mxu0  ;;  %v1410_v11 = vrot.slane %v3532_v40, %v1409_v4 }
 0xb48   :  { %v1261_v14 = vadd.f32 %v1260_v13, %v1187_v10 }
 0xb49   :  { %v1272_v15 = vmul.f32 0.70710677, %v1266_v12  ;;  %v1270_v22 = vmul.f32 0.5, %v1266_v12 }
 0xb4a   :  { %v1271_v16 = vmul.f32 0.70710677, %v1261_v14  ;;  %v1269_v20 = vmul.f32 0.5, %v1261_v14 }
 0xb4b   :  { %3381 = verf.f32 %v1272_v15 }
 0xb4c   :  { %3383 = verf.f32 %v1271_v16  ;;  %v3753_v16 = vld [vmem:[%s3955_s7 + $0x8] sm:$0xff] }
 0xb4d   :  { %v1423_v40 = vrot.slane %v3753_v16, %v3527_v39 }
 0xb55   :  { %v3382_v17 = vpop.eup %3381 }
 0xb56   :  { %v3384_v19 = vpop.eup %3383  ;;  %v1276_v18 = vadd.f32 1.0, %v3382_v17 }
 0xb57   :  { %v1275_v21 = vadd.f32 1.0, %v3384_v19 }
 0xb58   :  { %v1278_v24 = vmul.f32 %v1276_v18, %v1270_v22 }
 0xb59   :  { %v1277_v23 = vmul.f32 %v1275_v21, %v1269_v20 }
 0xb5b   :  { %3132 = vmatprep.mubr.msk.f32.mxu1 %vm1291_vm4, %v1277_v23 }
 0xb5c   :  { %3133 = vmatmul.mubr.msk.f32.vlgmr.msra.gmra.mrb[14].mxu1 %vm1291_vm4, %v1278_v24 }
 0xb5d   :  { %3153 = vmatprep.mubr.msk.f32.mxu1 %vm3420_vm1, %v3419_v36 }
 0xc2f   :  { %v3134_v27 = vpop.f32.mrb[14].mxu1 }
 0xc30   :  { %v1370_v28 = vadd.f32 %v3134_v27, %v1290_v26  ;;  %v1364_v30 = vpop.f32.mrb[15].mxu1 }
 0xc31   :  { %v1365_v31 = vadd.f32 %v1364_v30, %v1290_v26 }
 0xc32   :  { %v1374_v32 = vadd.f32 %v1370_v28, %v1179_v61  ;;  %v3303_v61 = vpack.c.bf16 %v2878_v60, %v2877_v59  ;;  %v2881_v60 = vld [vmem:[%s3957_s4 + $0x20] sm:$0xff] }
 0xc33   :  { %v1373_v41 = vadd.f32 %v1365_v31, %v3660_v47  ;;  %v2875_v47 = vld [vmem:[%s3953_s3 + $0x20] sm:$0xff] }
 0xc34   :  { %v1378_v42 = vsel %vm40_vm0, %v1374_v32, 0.0  ;;  %v3299_v58 = vpack.c.bf16 %v2876_v57, %v2875_v47 }
 0xc35   :  { %1379 = vadd.xlane.f32.xlu1 %v1378_v42  ;;  %v1375_v44 = vsel %vm40_vm0, %v1373_v41, 0.0 }
 0xc36   :  { %1376 = vadd.xlane.f32.xlu0 %v1375_v44  ;;  %3300 = vmatprep.subr.bf16.mxu0 %v3299_v58 }
 0xc37   :  { %3302 = vmatpush3.bf16.msra.mxu0 %v3299_v58 }
 0xc38   :  { %3304 = vmatprep.subr.bf16.mxu0 %v3303_v61 }
 0xc3b   :  { %3306 = vmatpush3.bf16.msra.mxu0 %v3303_v61  ;;  %v2882_v61 = vld [vmem:[%s3957_s4 + $0x28] sm:$0xff] }
 0xc3c   :  { %3146 = vmatprep.subr.mxu0 %v3419_v36 }
 0xcc2   :  { %v1380_v45 = vpop.xlane.xlu1 %1379 }
 0xcc3   :  { %v1382_v46 = vmul.f32 0.03125, %v1380_v45  ;;  %v1377_v48 = vpop.xlane.xlu0 %1376 }
 0xcc4   :  { %v1381_v49 = vmul.f32 0.03125, %v1377_v48 }
 0xcc5   :  { %v1384_v51 = vsub.f32 %v1374_v32, %v1382_v46 }
 0xcc6   :  { %v1383_v52 = vsub.f32 %v1373_v41, %v1381_v49 }
 0xcc7   :  { %v1386_v53 = vmul.f32 %v1384_v51, %v1384_v51 }
 0xcc8   :  { %v1385_v54 = vmul.f32 %v1383_v52, %v1383_v52 }
 0xcc9   :  { %v1390_v55 = vsel %vm40_vm0, %v1386_v53, 0.0 }
 0xcca   :  { %1391 = vadd.xlane.f32.xlu1 %v1390_v55  ;;  %v1387_v56 = vsel %vm40_vm0, %v1385_v54, 0.0  ;;  %v2883_v54 = vld [vmem:[%s3957_s4 + $0x30] sm:$0xff]  ;;  %v2884_v55 = vld [vmem:[%s3957_s4 + $0x38] sm:$0xff] }
 0xccb   :  { %1388 = vadd.xlane.f32.xlu0 %v1387_v56  ;;  %v3308_v56 = vpack.c.bf16 %v2884_v55, %v2883_v54 }
 0xd57   :  { %v1392_v33 = vpop.xlane.xlu1 %1391 }
 0xd58   :  { %v1394_v62 = vmul.f32 0.03125, %v1392_v33  ;;  %v1389_v63 = vpop.xlane.xlu0 %1388 }
 0xd59   :  { %v1393_v0 = vmul.f32 0.03125, %v1389_v63  ;;  %v3803_v63 = vpack.c.bf16 %v2882_v61, %v2881_v60 }
 0xd5a   :  { %v1396_v1 = vadd.f32 1e-12, %v1394_v62 }
 0xd5b   :  { %v1395_v2 = vadd.f32 1e-12, %v1393_v0 }
 0xd5c   :  { %3385 = vrsqrt.f32 %v1396_v1 }
 0xd5d   :  { %3387 = vrsqrt.f32 %v1395_v2 }
 0xd66   :  { %v3386_v7 = vpop.eup %3385 }
 0xd67   :  { %v3388_v43 = vpop.eup %3387  ;;  %v1400_v8 = vmul.f32 %v3386_v7, %v1384_v51 }
 0xd68   :  { %v1399_v10 = vmul.f32 %v3388_v43, %v1383_v52 }
 0xd69   :  { %v1406_v12 = vmul.f32 %v1404_v5, %v1400_v8 }
 0xd6a   :  { %v1405_v13 = vmul.f32 %v1404_v5, %v1399_v10 }
 0xd6b   :  { %v3742_v15 = vadd.f32 %v1410_v11, %v1406_v12 }
 0xd6c   :  { %v3740_v14 = vadd.f32 %v1410_v11, %v1405_v13 }
 0xd6e   :  { %3143 = vmatprep.mubr.msk.f32.mxu0 %vm40_vm0, %v3740_v14 }
 0xd6f   :  { %3144 = vmatmul.mubr.msk.f32.vlgmr.msra.gmra.mrb[14].mxu0 %vm40_vm0, %v3742_v15 }
 0xd70   :  { %3148 = vmatprep.mubr.msk.f32.mxu0 %vm3420_vm1, %v3419_v36 }
 0xe42   :  { %v3145_v17 = vpop.f32.mrb[14].mxu0 }
 0xe43   :  { %v3757_v19 = vadd.f32 %v3145_v17, %v1423_v40  ;;  %v1496_v18 = vpop.f32.mrb[15].mxu0 }
 0xe44   :  { %v1497_v20 = vadd.f32 %v1496_v18, %v1423_v40 }
 0xe46   :  { %1676 = vrot.lane.b32.xlu1 %v1497_v20, %s3421_s29  ;;  %1511 = vrot.lane.b32.xlu0 %v1497_v20, %s3422_s30 }
 0xe4a   :  { %1674 = vrot.lane.b32.xlu1 %v1497_v20, %s3423_s11 }
 0xeb8   :  { %v1512_v21 = vpop.permute.xlu0 %1511  ;;  %v1677_v22 = vpop.permute.xlu1 %1676 }
 0xeb9   :  { %3147 = vmatpush3.xpose.msk.msra.mxu0 %vm181_vm2, %v1512_v21 }
 0xeba   :  { %3156 = vmatprep.subr.mxu0 %v3419_v36 }
 0xebc   :  { %3149 = vmatmul.mubr.msk.f32.vlgmr.msra.gmra.mrb[16].mxu0 %vm181_vm2, %v1497_v20  ;;  %v1675_v39 = vpop.permute.xlu1 %1674 }
 0xebd   :  { %3157 = vmatpush3.xpose.msk.msra.mxu0 %vm181_vm2, %v1677_v22  ;;  %3158 = vmatprep.mubr.msk.f32.mxu0 %vm3420_vm1, %v3419_v36 }
 0xebe   :  { %3307 = vmatprep.subr.bf16.mxu0 %v3426_v6 }
 0xec0   :  { %3159 = vmatmul.mubr.msk.f32.vlgmr.msra.gmra.mrb[18].mxu0 %vm181_vm2, %v1675_v39 }
 0xec1   :  { %3170 = vmatprep.mubr.msk.f32.mxu0 %vm3420_vm1, %v3419_v36  ;;  %3309 = vmatpush3.bf16.msra.mxu0 %v3308_v56 }
 0xec2   :  { %3180 = vmatprep.subr.mxu0 %v3419_v36 }
 0xf8f   :  { %v1583_v23 = vpop.f32.mrb[16].mxu0 }
 0xf90   :  { %v1584_v24 = vadd.f32 %v1583_v23, %v3557_v50  ;;  %v3150_v26 = vpop.f32.mrb[17].mxu0 }
 0xf92   :  { %v1587_v27 = vsel %vm256_vm3, %v1584_v24, -inf }
 0xf93   :  { %1588 = vmax.xlane.f32.xlu1 %v1587_v27  ;;  %v1748_v28 = vpop.f32.mrb[18].mxu0 }
 0xf94   :  { %v1749_v30 = vadd.f32 %v1748_v28, %v3557_v50  ;;  %v3160_v31 = vpop.f32.mrb[19].mxu0  ;;  %v2465_v28 = vrot.slane %v3753_v16, %v3617_v29 }
 0xf96   :  { %v1752_v32 = vsel %vm256_vm3, %v1749_v30, -inf }
 0xf97   :  { %1753 = vmax.xlane.f32.xlu0 %v1752_v32 }
 0xfa4   :  { %1598 = vrot.lane.b32.xlu1 %v1497_v20, %s3424_s1 }
 0xfa8   :  { %1986 = vrot.lane.b32.xlu1 %v3757_v19, %s3422_s30 }
 0xfac   :  { %2151 = vrot.lane.b32.xlu1 %v3757_v19, %s3421_s29 }
 0xfb0   :  { %2149 = vrot.lane.b32.xlu1 %v3757_v19, %s3423_s11 }
0x1020   :  { %v1589_v41 = vpop.xlane.xlu1 %1588 }
0x1021   :  { %v1590_v42 = vsub.f32 %v1584_v24, %v1589_v41 }
0x1023   :  { %v1591_v44 = vmul.f32 1.442695, %v1590_v42 }
0x1024   :  { %v1599_v45 = vpop.permute.xlu1 %1598  ;;  %v1754_v50 = vpop.xlane.xlu0 %1753 }
0x1025   :  { %3389 = vpow2.f32 %v1591_v44  ;;  %v1755_v46 = vsub.f32 %v1749_v30, %v1754_v50  ;;  %3152 = vmatpush3.msra.mxu1 %v1599_v45 }
0x1026   :  { %3161 = vmatprep.subr.mxu1 %v3419_v36 }
0x1027   :  { %v1756_v48 = vmul.f32 1.442695, %v1755_v46 }
0x1028   :  { %v1987_v1 = vpop.permute.xlu1 %1986 }
0x1029   :  { %3391 = vpow2.f32 %v1756_v48 }
0x102c   :  { %v2152_v8 = vpop.permute.xlu1 %2151 }
0x102f   :  { %v3390_v49 = vpop.eup %3389 }
0x1030   :  { %v1593_v51 = vsel %vm256_vm3, %v3390_v49, 0.0  ;;  %v2150_v10 = vpop.permute.xlu1 %2149 }
0x1031   :  { %1594 = vadd.xlane.f32.xlu0 %v1593_v51 }
0x1033   :  { %v3392_v52 = vpop.eup %3391 }
0x1034   :  { %v1758_v53 = vsel %vm256_vm3, %v3392_v52, 0.0 }
0x1035   :  { %1759 = vadd.xlane.f32.xlu0 %v1758_v53 }
0x104b   :  { %1763 = vrot.lane.b32.xlu0 %v1497_v20, %s3425_s14 }
0x10be   :  { %v1595_v47 = vpop.xlane.xlu0 %1594 }
0x10bf   :  { %3393 = vrcp.f32 %v1595_v47 }
0x10c2   :  { %v1760_v57 = vpop.xlane.xlu0 %1759 }
0x10c3   :  { %3395 = vrcp.f32 %v1760_v57 }
0x10c6   :  { %v1764_v33 = vpop.permute.xlu0 %1763 }
0x10c9   :  { %v3394_v58 = vpop.eup %3393 }
0x10ca   :  { %v1597_v59 = vmul.f32 %v3394_v58, %v3390_v49 }
0x10cc   :  { %3154 = vmatmul.mubr.msk.f32.vlgmr.msra.gmra.mrb[16].mxu1 %vm256_vm3, %v1597_v59 }
0x10cd   :  { %v3396_v62 = vpop.eup %3395  ;;  %3162 = vmatpush3.msra.mxu1 %v1764_v33  ;;  %3163 = vmatprep.mubr.msk.f32.mxu1 %vm3420_vm1, %v3419_v36 }
0x10ce   :  { %v1762_v0 = vmul.f32 %v3396_v62, %v3392_v52  ;;  %3310 = vmatprep.subr.bf16.mxu1 %v3426_v6 }
0x10d0   :  { %3164 = vmatmul.mubr.msk.f32.vlgmr.msra.gmra.mrb[18].mxu1 %vm256_vm3, %v1762_v0 }
0x10d1   :  { %3312 = vmatpush3.bf16.msra.mxu1 %v3803_v63  ;;  %3177 = vmatprep.mubr.msk.f32.mxu1 %vm3420_vm1, %v3419_v36 }
0x10d2   :  { %3185 = vmatprep.subr.mxu1 %v3419_v36 }
0x119f   :  { %v1670_v2 = vpop.f32.mrb[16].mxu1 }
0x11a0   :  { %v3155_v5 = vpop.f32.mrb[17].mxu1  ;;  %3178 = vmatmul.mubr.msk.f32.vlgmr.msra.gmra.mrb[20].mxu1 %vm181_vm2, %v1670_v2 }
0x11a1   :  { %3187 = vmatprep.mubr.msk.f32.mxu1 %vm3420_vm1, %v3419_v36 }
0x11a3   :  { %v1835_v7 = vpop.f32.mrb[18].mxu1 }
0x11a4   :  { %v3165_v43 = vpop.f32.mrb[19].mxu1  ;;  %3171 = vmatmul.mubr.msk.f32.vlgmr.msra.gmra.mrb[20].mxu0 %vm181_vm2, %v1835_v7 }
0x11a5   :  { %3181 = vmatpush3.xpose.msk.msra.mxu0 %vm181_vm2, %v1987_v1  ;;  %3182 = vmatprep.mubr.msk.f32.mxu0 %vm3420_vm1, %v3419_v36 }
0x11a6   :  { %3190 = vmatprep.subr.mxu0 %v3419_v36 }
0x11a8   :  { %3183 = vmatmul.mubr.msk.f32.vlgmr.msra.gmra.mrb[22].mxu0 %vm181_vm2, %v3757_v19 }
0x11a9   :  { %3191 = vmatpush3.xpose.msk.msra.mxu0 %vm181_vm2, %v2152_v8  ;;  %3192 = vmatprep.mubr.msk.f32.mxu0 %vm3420_vm1, %v3419_v36 }
0x11aa   :  { %3313 = vmatprep.subr.bf16.mxu0 %v3426_v6 }
0x11ac   :  { %3193 = vmatmul.mubr.msk.f32.vlgmr.msra.gmra.mrb[24].mxu0 %vm181_vm2, %v2150_v10 }
0x11ad   :  { %3315 = vmatpush3.bf16.msra.mxu0 %v3308_v56  ;;  %3204 = vmatprep.mubr.msk.f32.mxu0 %vm3420_vm1, %v3419_v36 }
0x1273   :  { %v1981_v11 = vpop.f32.mrb[20].mxu1 }
0x1274   :  { %v3179_v12 = vpop.f32.mrb[21].mxu1 }
0x1277   :  { %v1908_v13 = vpop.f32.mrb[20].mxu0 }
0x1278   :  { %v1982_v40 = vadd.f32 %v1981_v11, %v1908_v13  ;;  %v3172_v17 = vpop.f32.mrb[21].mxu0 }
0x127a   :  { %v2460_v27 = vadd.f32 %v1982_v40, %v3740_v14 }
0x127b   :  { %v2058_v18 = vpop.f32.mrb[22].mxu0 }
0x127c   :  { %v2059_v20 = vadd.f32 %v2058_v18, %v3621_v34  ;;  %v3184_v21 = vpop.f32.mrb[23].mxu0  ;;  %v2466_v30 = vadd.f32 %v2465_v28, %v2460_v27 }
0x127e   :  { %v2062_v22 = vsel %vm256_vm3, %v2059_v20, -inf  ;;  %v2468_v31 = vsel %vm40_vm0, %v2466_v30, 0.0 }
0x127f   :  { %2063 = vmax.xlane.f32.xlu0 %v2062_v22  ;;  %v2223_v39 = vpop.f32.mrb[24].mxu0 }
0x1280   :  { %v2224_v23 = vadd.f32 %v2223_v39, %v3621_v34  ;;  %v3194_v24 = vpop.f32.mrb[25].mxu0  ;;  %v2503_v39 = vrot.slane %v3753_v16, %v1176_v37  ;;  %v2903_v37 = vld [vmem:[%s3958_s5 + $0x30] sm:$0xff] }
0x1282   :  { %v2227_v26 = vsel %vm256_vm3, %v2224_v23, -inf }
0x1283   :  { %2228 = vmax.xlane.f32.xlu1 %v2227_v26  ;;  %v2901_v26 = vld [vmem:[%s3958_s5 + $0x20] sm:$0xff] }
0x1294   :  { %2238 = vrot.lane.b32.xlu1 %v3757_v19, %s3425_s14 }
0x12b8   :  { %2469 = vadd.xlane.f32.xlu1 %v2468_v31 }
0x130c   :  { %v2064_v32 = vpop.xlane.xlu0 %2063 }
0x130d   :  { %v2065_v41 = vsub.f32 %v2059_v20, %v2064_v32 }
0x130f   :  { %v2066_v42 = vmul.f32 1.442695, %v2065_v41 }
0x1310   :  { %v2229_v34 = vpop.xlane.xlu1 %2228 }
0x1311   :  { %3397 = vpow2.f32 %v2066_v42  ;;  %v2230_v44 = vsub.f32 %v2224_v23, %v2229_v34 }
0x1313   :  { %v2231_v45 = vmul.f32 1.442695, %v2230_v44 }
0x1314   :  { %v2239_v54 = vpop.permute.xlu1 %2238 }
0x1315   :  { %3399 = vpow2.f32 %v2231_v45 }
0x131b   :  { %v3398_v50 = vpop.eup %3397 }
0x131c   :  { %v2068_v46 = vsel %vm256_vm3, %v3398_v50, 0.0 }
0x131d   :  { %2069 = vadd.xlane.f32.xlu0 %v2068_v46  ;;  %v2908_v46 = vld [vmem:[%s3959_s6 + $0x48] sm:$0xff] }
0x131f   :  { %v3400_v14 = vpop.eup %3399 }
0x1320   :  { %v2233_v48 = vsel %vm256_vm3, %v3400_v14, 0.0 }
0x1321   :  { %2234 = vadd.xlane.f32.xlu0 %v2233_v48  ;;  %v2909_v48 = vld [vmem:[%s3959_s6 + $0x50] sm:$0xff] }
0x1337   :  { %2073 = vrot.lane.b32.xlu0 %v3757_v19, %s3424_s1 }
0x1345   :  { %v2470_v59 = vpop.xlane.xlu1 %2469 }
0x1346   :  { %v2474_v33 = vmul.f32 0.03125, %v2470_v59 }
0x1348   :  { %v2476_v2 = vsub.f32 %v2466_v30, %v2474_v33 }
0x134a   :  { %v2478_v43 = vmul.f32 %v2476_v2, %v2476_v2 }
0x134c   :  { %v2480_v8 = vsel %vm40_vm0, %v2478_v43, 0.0 }
0x13aa   :  { %v2070_v29 = vpop.xlane.xlu0 %2069 }
0x13ab   :  { %3401 = vrcp.f32 %v2070_v29  ;;  %v2910_v29 = vld [vmem:[%s3959_s6 + $0x58] sm:$0xff] }
0x13ae   :  { %v2235_v49 = vpop.xlane.xlu0 %2234 }
0x13af   :  { %3403 = vrcp.f32 %v2235_v49  ;;  %v2911_v49 = vld [vmem:[%s3959_s6 + $0x60] sm:$0xff] }
0x13b2   :  { %v2074_v51 = vpop.permute.xlu0 %2073 }
0x13b3   :  { %3186 = vmatpush3.msra.mxu1 %v2074_v51  ;;  %v2912_v51 = vld [vmem:[%s3959_s6 + $0x68] sm:$0xff] }
0x13b4   :  { %3195 = vmatprep.subr.mxu1 %v3419_v36 }
0x13b5   :  { %v3402_v52 = vpop.eup %3401 }
0x13b6   :  { %v2072_v53 = vmul.f32 %v3402_v52, %v3398_v50  ;;  %v2907_v50 = vld [vmem:[%s3959_s6 + $0x40] sm:$0xff]  ;;  %v3335_v52 = vpack.c.bf16 %v2912_v51, %v2911_v49 }
0x13b8   :  { %3188 = vmatmul.mubr.msk.f32.vlgmr.msra.gmra.mrb[22].mxu1 %vm256_vm3, %v2072_v53  ;;  %v2913_v53 = vld [vmem:[%s3959_s6 + $0x70] sm:$0xff] }
0x13b9   :  { %v3404_v55 = vpop.eup %3403  ;;  %3196 = vmatpush3.msra.mxu1 %v2239_v54  ;;  %3197 = vmatprep.mubr.msk.f32.mxu1 %vm3420_vm1, %v3419_v36  ;;  %v2914_v54 = vld [vmem:[%s3959_s6 + $0x78] sm:$0xff] }
0x13ba   :  { %v2237_v56 = vmul.f32 %v3404_v55, %v3400_v14  ;;  %3316 = vmatprep.subr.bf16.mxu1 %v3426_v6  ;;  %v3327_v14 = vpack.c.bf16 %v2908_v46, %v2907_v50  ;;  %v3339_v55 = vpack.c.bf16 %v2914_v54, %v2913_v53 }
0x13bc   :  { %3198 = vmatmul.mubr.msk.f32.vlgmr.msra.gmra.mrb[24].mxu1 %vm256_vm3, %v2237_v56  ;;  %v2514_v56 = vrot.slane %v3753_v16, %v1186_v9  ;;  %v2618_v9 = vrot.slane %v3753_v16, %v1289_v25 }
0x13bd   :  { %3318 = vmatpush3.bf16.msra.mxu1 %v3803_v63  ;;  %3211 = vmatprep.mubr.msk.f32.mxu1 %vm3420_vm1, %v3419_v36 }
0x13be   :  { %3328 = vmatprep.subr.bf16.mxu1 %v3327_v14 }
0x148b   :  { %v2145_v19 = vpop.f32.mrb[22].mxu1 }
0x148c   :  { %v3189_v47 = vpop.f32.mrb[23].mxu1  ;;  %3212 = vmatmul.mubr.msk.f32.vlgmr.msra.gmra.mrb[26].mxu1 %vm181_vm2, %v2145_v19 }
0x148d   :  { %3330 = vmatpush3.bf16.msra.mxu1 %v3327_v14 }
0x148f   :  { %v2310_v57 = vpop.f32.mrb[24].mxu1 }
0x1490   :  { %v3199_v58 = vpop.f32.mrb[25].mxu1  ;;  %3205 = vmatmul.mubr.msk.f32.vlgmr.msra.gmra.mrb[26].mxu0 %vm181_vm2, %v2310_v57 }
0x155f   :  { %v2456_v60 = vpop.f32.mrb[26].mxu1 }
0x1560   :  { %v3213_v61 = vpop.f32.mrb[27].mxu1 }
0x1563   :  { %v2383_v62 = vpop.f32.mrb[26].mxu0 }
0x1564   :  { %v2457_v0 = vadd.f32 %v2456_v60, %v2383_v62  ;;  %v3206_v1 = vpop.f32.mrb[27].mxu0 }
0x1566   :  { %v2461_v63 = vadd.f32 %v2457_v0, %v3742_v15  ;;  %v2497_v15 = vrot.slane %v3753_v16, %v1170_v35  ;;  %v2902_v35 = vld [vmem:[%s3958_s5 + $0x28] sm:$0xff] }
0x1567   :  { %v3319_v27 = vpack.c.bf16 %v2902_v35, %v2901_v26  ;;  %v2746_v35 = vld [vmem:[%s3960_s8 + $0x8] sm:$0xff] }
0x1568   :  { %v2467_v5 = vadd.f32 %v2465_v28, %v2461_v63  ;;  %v2904_v28 = vld [vmem:[%s3958_s5 + $0x38] sm:$0xff] }
0x1569   :  { %3320 = vmatprep.subr.bf16.mxu0 %v3319_v27  ;;  %v3323_v30 = vpack.c.bf16 %v2904_v28, %v2903_v37  ;;  %v2747_v37 = vld [vmem:[%s3960_s8 + $0x10] sm:$0xff]  ;;  %v2748_v28 = vld [vmem:[%s3960_s8 + $0x18] sm:$0xff] }
0x156a   :  { %v2471_v7 = vsel %vm40_vm0, %v2467_v5, 0.0  ;;  %3322 = vmatpush3.bf16.msra.mxu0 %v3319_v27 }
0x156b   :  { %2472 = vadd.xlane.f32.xlu0 %v2471_v7  ;;  %3324 = vmatprep.subr.bf16.mxu0 %v3323_v30 }
0x156e   :  { %3326 = vmatpush3.bf16.msra.mxu0 %v3323_v30  ;;  %v3347_v30 = vpack.c.bf16 %v2748_v28, %v2747_v37 }
0x156f   :  { %2481 = vadd.xlane.f32.xlu0 %v2480_v8  ;;  %3343 = vmatprep.subr.bf16.mxu0 %v3426_v6 }
0x15f8   :  { %v2473_v10 = vpop.xlane.xlu0 %2472 }
0x15f9   :  { %v2475_v11 = vmul.f32 0.03125, %v2473_v10 }
0x15fb   :  { %v2477_v12 = vsub.f32 %v2467_v5, %v2475_v11 }
0x15fc   :  { %v2482_v13 = vpop.xlane.xlu0 %2481 }
0x15fd   :  { %v2486_v40 = vmul.f32 0.03125, %v2482_v13  ;;  %v2479_v17 = vmul.f32 %v2477_v12, %v2477_v12 }
0x15ff   :  { %v2488_v18 = vadd.f32 1e-12, %v2486_v40  ;;  %v2483_v20 = vsel %vm40_vm0, %v2479_v17, 0.0 }
0x1600   :  { %2484 = vadd.xlane.f32.xlu1 %v2483_v20 }
0x1601   :  { %3405 = vrsqrt.f32 %v2488_v18 }
0x160b   :  { %v3406_v21 = vpop.eup %3405 }
0x160c   :  { %v2492_v22 = vmul.f32 %v3406_v21, %v2476_v2 }
0x160e   :  { %v2498_v23 = vmul.f32 %v2497_v15, %v2492_v22 }
0x1610   :  { %v3863_v24 = vadd.f32 %v2503_v39, %v2498_v23 }
0x1612   :  { %3222 = vmatprep.mubr.msk.f32.mxu0 %vm40_vm0, %v3863_v24 }
0x168d   :  { %v2485_v31 = vpop.xlane.xlu1 %2484 }
0x168e   :  { %v2487_v32 = vmul.f32 0.03125, %v2485_v31 }
0x1690   :  { %v2489_v41 = vadd.f32 1e-12, %v2487_v32 }
0x1692   :  { %3407 = vrsqrt.f32 %v2489_v41 }
0x169c   :  { %v3408_v42 = vpop.eup %3407 }
0x169d   :  { %v2493_v34 = vmul.f32 %v3408_v42, %v2477_v12 }
0x169f   :  { %v2499_v44 = vmul.f32 %v2497_v15, %v2493_v34 }
0x16a1   :  { %v2505_v45 = vadd.f32 %v2503_v39, %v2499_v44 }
0x16a3   :  { %3223 = vmatmul.mubr.msk.f32.vlgmr.msra.gmra.mrb[28].mxu0 %vm40_vm0, %v2505_v45 }
0x16a4   :  { %3252 = vmatprep.mubr.msk.f32.mxu0 %vm3420_vm1, %v3419_v36  ;;  %v3331_v36 = vpack.c.bf16 %v2910_v29, %v2909_v48 }
0x16a6   :  { %3332 = vmatprep.subr.bf16.mxu1 %v3331_v36 }
0x16a7   :  { %3334 = vmatpush3.bf16.msra.mxu1 %v3331_v36 }
0x16a8   :  { %3336 = vmatprep.subr.bf16.mxu1 %v3335_v52 }
0x16ab   :  { %3338 = vmatpush3.bf16.msra.mxu1 %v3335_v52 }
0x16ac   :  { %3340 = vmatprep.subr.bf16.mxu1 %v3339_v55 }
0x16af   :  { %3342 = vmatpush3.bf16.msra.mxu1 %v3339_v55 }
0x1776   :  { %v3224_v19 = vpop.f32.mrb[28].mxu0 }
0x1777   :  { %v2593_v47 = vadd.f32 %v3224_v19, %v2514_v56  ;;  %v2587_v57 = vpop.f32.mrb[29].mxu0 }
0x1778   :  { %v2588_v58 = vadd.f32 %v2587_v57, %v2514_v56 }
0x1779   :  { %v2599_v59 = vmul.f32 0.70710677, %v2593_v47  ;;  %v2597_v2 = vmul.f32 0.5, %v2593_v47  ;;  %v2920_v47 = vld [vmem:[%s3961_s9 + $0x2] ss:$0 sm:$0xff] }
0x177a   :  { %v2598_v60 = vmul.f32 0.70710677, %v2588_v58  ;;  %v2596_v0 = vmul.f32 0.5, %v2588_v58 }
0x177b   :  { %3409 = verf.f32 %v2599_v59 }
0x177c   :  { %3411 = verf.f32 %v2598_v60 }
0x1785   :  { %v3410_v61 = vpop.eup %3409 }
0x1786   :  { %v3412_v33 = vpop.eup %3411  ;;  %v2603_v62 = vadd.f32 1.0, %v3410_v61 }
0x1787   :  { %v2602_v1 = vadd.f32 1.0, %v3412_v33 }
0x1788   :  { %v2605_v5 = vmul.f32 %v2603_v62, %v2597_v2 }
0x1789   :  { %v2604_v63 = vmul.f32 %v2602_v1, %v2596_v0 }
0x178b   :  { %3241 = vmatprep.mubr.msk.f32.mxu1 %vm1291_vm4, %v2604_v63 }
0x178c   :  { %3242 = vmatmul.mubr.msk.f32.vlgmr.msra.gmra.mrb[28].mxu1 %vm1291_vm4, %v2605_v5 }
0x185f   :  { %v3243_v7 = vpop.f32.mrb[28].mxu1 }
0x1860   :  { %v2697_v43 = vadd.f32 %v3243_v7, %v2618_v9  ;;  %v2691_v8 = vpop.f32.mrb[29].mxu1 }
0x1861   :  { %v2692_v10 = vadd.f32 %v2691_v8, %v2618_v9 }
0x1862   :  { %v2701_v11 = vadd.f32 %v2697_v43, %v2505_v45  ;;  %v2731_v45 = vrot.slane %v3753_v16, %v1403_v3  ;;  %v2917_v3 = vld [vmem:[%s3961_s9] ss:$0 sm:$0xff] }
0x1863   :  { %v2700_v12 = vadd.f32 %v2692_v10, %v3863_v24  ;;  %v2745_v24 = vld [vmem:[%s3960_s8] sm:$0xff] }
0x1864   :  { %v2705_v13 = vsel %vm40_vm0, %v2701_v11, 0.0  ;;  %v3344_v27 = vpack.c.bf16 %v2746_v35, %v2745_v24 }
0x1865   :  { %2706 = vadd.xlane.f32.xlu0 %v2705_v13  ;;  %v2702_v40 = vsel %vm40_vm0, %v2700_v12, 0.0 }
0x1866   :  { %2703 = vadd.xlane.f32.xlu1 %v2702_v40  ;;  %3345 = vmatpush3.bf16.msra.mxu0 %v3344_v27 }
0x1867   :  { %3346 = vmatprep.subr.bf16.mxu0 %v3426_v6  ;;  %v2737_v6 = vrot.slane %v3753_v16, %v1409_v4 }
0x186a   :  { %3348 = vmatpush3.bf16.msra.mxu0 %v3347_v30 }
0x18f2   :  { %v2707_v17 = vpop.xlane.xlu0 %2706 }
0x18f3   :  { %v2709_v18 = vmul.f32 0.03125, %v2707_v17  ;;  %v2704_v20 = vpop.xlane.xlu1 %2703 }
0x18f4   :  { %v2708_v15 = vmul.f32 0.03125, %v2704_v20 }
0x18f5   :  { %v2711_v21 = vsub.f32 %v2701_v11, %v2709_v18 }
0x18f6   :  { %v2710_v22 = vsub.f32 %v2700_v12, %v2708_v15 }
0x18f7   :  { %v2713_v25 = vmul.f32 %v2711_v21, %v2711_v21 }
0x18f8   :  { %v2712_v39 = vmul.f32 %v2710_v22, %v2710_v22 }
0x18f9   :  { %v2717_v23 = vsel %vm40_vm0, %v2713_v25, 0.0 }
0x18fa   :  { %2718 = vadd.xlane.f32.xlu0 %v2717_v23  ;;  %v2714_v26 = vsel %vm40_vm0, %v2712_v39, 0.0 }
0x18fb   :  { %2715 = vadd.xlane.f32.xlu1 %v2714_v26 }
0x1987   :  { %v2719_v31 = vpop.xlane.xlu0 %2718 }
0x1988   :  { %v2721_v32 = vmul.f32 0.03125, %v2719_v31  ;;  %v2716_v41 = vpop.xlane.xlu1 %2715 }
0x1989   :  { %v2720_v42 = vmul.f32 0.03125, %v2716_v41 }
0x198a   :  { %v2723_v34 = vadd.f32 1e-12, %v2721_v32 }
0x198b   :  { %v2722_v44 = vadd.f32 1e-12, %v2720_v42 }
0x198c   :  { %3413 = vrsqrt.f32 %v2723_v34 }
0x198d   :  { %3415 = vrsqrt.f32 %v2722_v44 }
0x1996   :  { %v3414_v50 = vpop.eup %3413 }
0x1997   :  { %v3416_v46 = vpop.eup %3415  ;;  %v2727_v14 = vmul.f32 %v3414_v50, %v2711_v21 }
0x1998   :  { %v2726_v48 = vmul.f32 %v3416_v46, %v2710_v22 }
0x1999   :  { %v2733_v29 = vmul.f32 %v2731_v45, %v2727_v14 }
0x199a   :  { %v2732_v36 = vmul.f32 %v2731_v45, %v2726_v48 }
0x199b   :  { %v2739_v49 = vadd.f32 %v2737_v6, %v2733_v29 }
0x199c   :  { %v2738_v51 = vadd.f32 %v2737_v6, %v2732_v36 }
0x199d   :  { %v2741_v52 = vrot.slane %v2739_v49, 7 }
0x199f   :  { %v2744_v53 = vsel %vm2743_vm5, %v2738_v51, %v2741_v52 }
0x19a0   :  { %3253 = vmatmul.mubr.msk.f32.vlgmr.msra.gmra.mrb[30].mxu0 %vm40_vm0, %v2744_v53 }
0x1a73   :  { %v2823_v54 = vpop.f32.mrb[30].mxu0 }
0x1a74   :  { %v2824_v55 = vadd.f32 %v2917_v3, %v2823_v54  ;;  %v3254_v56 = vpop.f32.mrb[31].mxu0 }
0x1a76   :  { %3417 = vtanh.f32 %v2824_v55 }
0x1a80   :  { %v3418_v4 = vpop.eup %3417 }
0x1a81   :  { %v2834_v16 = vmul.f32 %v3418_v4, %v2919_v38 }
0x1a83   :  { %v2836_v19 = vsel %vm2835_vm6, %v2834_v16, 0.0 }
0x1a84   :  { %2837 = vadd.xlane.f32.xlu0 %v2836_v19 }
0x1b11   :  { %v2838_v57 = vpop.xlane.xlu0 %2837 }
0x1b12   :  { %v2843_v58 = vadd.f32 %v2920_v47, %v2838_v57 }
0x1b14   :  { %2845 = vst.msk [vmem:[%s3962_s10] sm:$0x3] %vm2844_vm7, %v2843_v58 }

</bundles_post_ra>
